<compile_context>
chip_gen: v7x
topology: tpu7x:2x2x1
jax: 0.10.0
libtpu: 0.0.40
codegen_flags: <defaults>
</compile_context>

<pallas_src>
import functools

import numpy as np
import jax
import jax.numpy as jnp
from jax import lax
from jax.experimental import pallas as pl
from jax.experimental.pallas import tpu as pltpu


_VMEM_LIMIT = 48 * 1024 * 1024  # headroom under v7x's 64 MiB physical VMEM


# ----------------------------- parameter init ------------------------------ #
def he_orthogonal_init_np(out_f, in_f, rng):
    """Deterministic replica of he_orthogonal_init (orthogonal -> standardize -> scale)."""
    n = max(out_f, in_f)
    a = rng.standard_normal((n, n))
    q, _ = np.linalg.qr(a)
    w = q[:out_f, :in_f]
    mean = w.mean(axis=1, keepdims=True)
    var = w.var(axis=1, ddof=1, keepdims=True)
    w = (w - mean) / np.sqrt(var + 1e-6)
    w = w * np.sqrt(1.0 / in_f)
    return w.astype(np.float32)


def _round_up(x, m):
    return (x + m - 1) // m * m


# ------------------------------ in-kernel silu ------------------------------ #
def _silu(x):
    # exp on the EUP; approximate reciprocal stays on the otherwise-idle EUP slot.
    return x * pl.reciprocal(1.0 + jnp.exp(-x), approx=True)


# ------------------- kernels 1 & 3: atom-parallel MLP stacks ----------------- #
def atom_mlp_kernel(x_ref, w_ref, o_ref, *, n_res, leading_dense, use_silu):
    act = _silu if use_silu else (lambda v: v)
    bf16 = jnp.bfloat16
    n_part = x_ref.shape[0]
    # Fused sum of the edge-kernel partial accumulators (n_part == 1 for pre_res).
    x = x_ref[0].astype(jnp.float32)
    for p in range(1, n_part):
        x = x + x_ref[p].astype(jnp.float32)
    off = 0
    if leading_dense:  # dense1 of the output MLP (ScalingFactor pre-folded into w_ref[0])
        x = act(jnp.dot(x.astype(bf16), w_ref[0], preferred_element_type=jnp.float32))
        off = 1
    for i in range(n_res):  # ResidualLayer: two bias-free Dense + skip (f32 residual stream)
        t = act(jnp.dot(x.astype(bf16), w_ref[off + 2 * i],
                        preferred_element_type=jnp.float32))
        t = act(jnp.dot(t.astype(bf16), w_ref[off + 2 * i + 1],
                        preferred_element_type=jnp.float32))
        x = x + t
    o_ref[...] = x.astype(o_ref.dtype)


def _atom_mlp(x, w_stack, *, leading_dense, use_silu, out_dtype, tile_a):
    """x: (n_part, a_pad, emb) partials; w_stack: (n_w, emb, emb) bf16."""
    n_part, a_pad, emb = x.shape
    n_w = w_stack.shape[0]
    n_res = (n_w - (1 if leading_dense else 0)) // 2
    kernel = functools.partial(atom_mlp_kernel, n_res=n_res,
                               leading_dense=leading_dense, use_silu=use_silu)
    return pl.pallas_call(
        kernel,
        out_shape=jax.ShapeDtypeStruct((a_pad, emb), out_dtype),
        grid_spec=pltpu.PrefetchScalarGridSpec(
            num_scalar_prefetch=0,
            grid=(a_pad // tile_a,),
            in_specs=[
                pl.BlockSpec((n_part, tile_a, emb), lambda i: (0, i, 0)),  # atom tile(s)
                pl.BlockSpec((n_w, emb, emb), lambda i: (0, 0, 0)),        # resident bf16 weights
            ],
            out_specs=pl.BlockSpec((tile_a, emb), lambda i: (i, 0)),
        ),
        compiler_params=pltpu.CompilerParams(
            dimension_semantics=("parallel",),          # both TensorCores on v7x
            vmem_limit_bytes=_VMEM_LIMIT),
    )(x, w_stack)


# ---------- kernel 2: edge gather * (bf @ W_bf) -> partial scatter-add ------- #
def edge_scatter_kernel(h_res_ref, bf_ref, idx_s_ref, idx_t_ref, w_bf_ref, o_ref):
    j = pl.program_id(1)  # reduction axis (edge tiles within this shard) is last

    @pl.when(j == 0)
    def _():
        o_ref[...] = jnp.zeros_like(o_ref)

    a_pad = h_res_ref.shape[0]
    tile_e = bf_ref.shape[0]

    # dense_bf: Linear(emb_bf -> emb), bf16 operands, f32 accumulation on the MXU.
    mlp_bf = jnp.dot(bf_ref[...], w_bf_ref[...], preferred_element_type=jnp.float32)

    # gather h_res[idx_s] as a bf16 one-hot matmul (0/1 exact in bf16, f32 accum).
    iota_ea = lax.broadcasted_iota(jnp.int32, (tile_e, a_pad), 1)
    onehot_s = (idx_s_ref[...] == iota_ea).astype(jnp.bfloat16)          # (E_t, A)
    gathered = jnp.dot(onehot_s, h_res_ref[...],
                       preferred_element_type=jnp.float32)               # (E_t, emb)

    # Hadamard product of gathered atom embeddings and radial-basis projection.
    x = gathered * mlp_bf                                                # (E_t, emb) f32

    # scatter-add into atoms via a second bf16 one-hot on the MXU, f32 accumulation.
    iota_ae = lax.broadcasted_iota(jnp.int32, (a_pad, tile_e), 0)
    onehot_t = (iota_ae == idx_t_ref[...]).astype(jnp.bfloat16)          # (A, E_t)
    x2 = jnp.dot(onehot_t, x.astype(jnp.bfloat16),
                 preferred_element_type=jnp.float32)                     # (A, emb)

    o_ref[0] = o_ref[0] + x2   # resident partial accumulator for this shard


def _edge_scatter(h_res, bf, idx_s, idx_t, w_bf, *, tile_e, n_part):
    a_pad, emb = h_res.shape
    e_pad, emb_bf = bf.shape
    tiles_per_part = e_pad // (n_part * tile_e)
    return pl.pallas_call(
        edge_scatter_kernel,
        out_shape=jax.ShapeDtypeStruct((n_part, a_pad, emb), jnp.float32),
        grid_spec=pltpu.PrefetchScalarGridSpec(
            num_scalar_prefetch=0,
            grid=(n_part, tiles_per_part),
            in_specs=[
                pl.BlockSpec((a_pad, emb), lambda c, j: (0, 0)),      # h_res bf16, resident
                pl.BlockSpec((tile_e, emb_bf),
                             lambda c, j: (c * tiles_per_part + j, 0)),  # bf16 edge tile
                pl.BlockSpec((tile_e, 1),
                             lambda c, j: (c * tiles_per_part + j, 0)),  # idx_s (E,1)
                pl.BlockSpec((1, tile_e),
                             lambda c, j: (0, c * tiles_per_part + j)),  # idx_t (1,E)
                pl.BlockSpec((emb_bf, emb), lambda c, j: (0, 0)),     # W_bf bf16, resident
            ],
            out_specs=pl.BlockSpec((1, a_pad, emb), lambda c, j: (c, 0, 0)),
        ),
        compiler_params=pltpu.CompilerParams(
            dimension_semantics=("parallel", "arbitrary"),  # edge shards across cores
            vmem_limit_bytes=_VMEM_LIMIT),
    )(h_res, bf, idx_s, idx_t, w_bf)


# --------------------- host-side one-time parameter prep --------------------- #
def prepare_hadamard_params(params, *, emb_atom, emb_bf, lane=128):
    """Padding, ScalingFactor folding and bf16 cast, hoisted out of the hot path."""
    ws = jnp.asarray(params["w_stack"], jnp.float32)       # (2 + 1 + 2*nHidden, E, E)
    w_bf = jnp.asarray(params["w_bf"], jnp.float32)        # (emb_bf, E)
    scale = jnp.asarray(params["scale"], jnp.float32)[0]   # ScalingFactor scalar
    emb_pad = _round_up(emb_atom, lane)

    w_pre = jnp.zeros((2, emb_pad, emb_pad), jnp.float32
                      ).at[:, :emb_atom, :emb_atom].set(ws[:2])
    # Fold the scalar ScalingFactor into dense1: (s*x) @ W == x @ (s*W).
    w_out_f32 = jnp.concatenate([ws[2:3] * scale, ws[3:]], axis=0)
    w_out = jnp.zeros((w_out_f32.shape[0], emb_pad, emb_pad), jnp.float32
                      ).at[:, :emb_atom, :emb_atom].set(w_out_f32)
    w_bf_p = jnp.zeros((emb_bf, emb_pad), jnp.float32).at[:, :emb_atom].set(w_bf)
    return {"w_pre": w_pre.astype(jnp.bfloat16),
            "w_out": w_out.astype(jnp.bfloat16),
            "w_bf": w_bf_p.astype(jnp.bfloat16)}


# ------------------------------- full forward ------------------------------- #
def hadamard_block_fwd(h, bf, idx_s, idx_t, prep, *, use_silu=True,
                       tile_a=256, tile_e=512, n_part=2):
    assert tile_a % 16 == 0 and tile_e % 128 == 0 and n_part >= 1
    n_atoms, emb_atom = h.shape
    n_edges, emb_bf = bf.shape
    w_pre, w_out, w_bf = prep["w_pre"], prep["w_out"], prep["w_bf"]
    emb_pad = w_pre.shape[-1]

    tile_a = min(tile_a, _round_up(n_atoms, 16))
    a_pad = _round_up(n_atoms, tile_a)
    tile_e = min(tile_e, _round_up(pl.cdiv(n_edges, n_part), 128))
    e_pad = _round_up(n_edges, n_part * tile_e)

    # Zero padding is exact: padded feature lanes / atom rows stay identically
    # zero through silu and the residual adds; padded edges carry bf == 0 so they
    # scatter exactly zero regardless of their dummy index 0.
    h_p = jnp.zeros((1, a_pad, emb_pad), jnp.float32
                    ).at[0, :n_atoms, :emb_atom].set(h.astype(jnp.float32))
    bf_p = jnp.zeros((e_pad, emb_bf), jnp.bfloat16
                     ).at[:n_edges, :].set(bf.astype(jnp.bfloat16))
    idx_s_p = jnp.zeros((e_pad, 1), jnp.int32).at[:n_edges, 0].set(idx_s.astype(jnp.int32))
    idx_t_p = jnp.zeros((1, e_pad), jnp.int32).at[0, :n_edges].set(idx_t.astype(jnp.int32))

    # 1) pre_residual (atom-parallel); h_res emitted & kept resident in bf16.
    h_res = _atom_mlp(h_p, w_pre, leading_dense=False, use_silu=use_silu,
                      out_dtype=jnp.bfloat16, tile_a=tile_a)
    # 2) x = h_res[idx_s] * (bf @ W_bf); n_part partial scatter-add accumulators.
    x2_parts = _edge_scatter(h_res, bf_p, idx_s_p, idx_t_p, w_bf,
                             tile_e=tile_e, n_part=n_part)
    # 3) output MLP (partial sum fused in): dense1 (scale folded) + residual blocks.
    out = _atom_mlp(x2_parts, w_out, leading_dense=True, use_silu=use_silu,
                    out_dtype=jnp.float32, tile_a=tile_a)
    return out[:n_atoms, :emb_atom]


hadamard_block = jax.jit(
    hadamard_block_fwd, static_argnames=("use_silu", "tile_a", "tile_e", "n_part"))


# --------------------------- pure-JAX references ---------------------------- #
def hadamard_block_ref(h, bf, idx_s, idx_t, params, *, n_hidden, use_silu=True):
    """f32 replica of the PyTorch module forward."""
    act = (lambda v: v * jax.nn.sigmoid(v)) if use_silu else (lambda v: v)
    ws = params["w_stack"]
    t = act(h @ ws[0]); t = act(t @ ws[1]); h_res = h + t
    mlp_bf = bf @ params["w_bf"]
    x = h_res[idx_s] * mlp_bf
    x2 = jnp.zeros_like(h).at[idx_t].add(x)
    x2 = x2 * params["scale"][0]
    x2 = act(x2 @ ws[2])
    for i in range(n_hidden):
        t = act(x2 @ ws[3 + 2 * i]); t = act(t @ ws[4 + 2 * i]); x2 = x2 + t
    return x2


def hadamard_block_ref_mixed(h, bf, idx_s, idx_t, prep, *, use_silu=True):
    """Same math on the prepared (padded, bf16) parameters, emulating the kernel's
    bf16-operand matmuls and the bf16 rounding of h_res / x before the scatter
    (exact sigmoid instead of the EUP approximate reciprocal)."""
    act = (lambda v: v * jax.nn.sigmoid(v)) if use_silu else (lambda v: v)
    f32, b16 = jnp.float32, jnp.bfloat16
    mm = lambda a, b: jnp.dot(a.astype(b16), b.astype(b16), preferred_element_type=f32)
    n_atoms, emb_atom = h.shape
    w_pre = prep["w_pre"].astype(f32)
    w_out = prep["w_out"].astype(f32)
    w_bf = prep["w_bf"].astype(f32)
    emb_pad = w_pre.shape[-1]
    hp = jnp.zeros((n_atoms, emb_pad), f32).at[:, :emb_atom].set(h)

    t = act(mm(hp, w_pre[0])); t = act(mm(t, w_pre[1]))
    h_res = (hp + t).astype(b16).astype(f32)
    mlp_bf = mm(bf, w_bf)
    x = h_res[idx_s] * mlp_bf
    x2 = jnp.zeros((n_atoms, emb_pad), f32).at[idx_t].add(x.astype(b16).astype(f32))
    x = act(mm(x2, w_out[0]))
    for i in range((w_out.shape[0] - 1) // 2):
        t = act(mm(x, w_out[1 + 2 * i])); t = act(mm(t, w_out[2 + 2 * i])); x = x + t
    return x[:, :emb_atom]


# ----------------------------------- main ----------------------------------- #
if __name__ == "__main__":
    n_atoms, n_edges = 64, 200
    emb_atom, emb_bf = 32, 16
    n_hidden = 2
    use_silu = True  # activation='silu' (module default is None; silu is the GemNet choice)

    # Deterministic parameters (PyTorch Linear.weight is (out, in); pre-transposed to (in, out)).
    rng = np.random.default_rng(0)
    sq_weights = [he_orthogonal_init_np(emb_atom, emb_atom, rng).T
                  for _ in range(2 + 1 + 2 * n_hidden)]  # pre_res(2) + dense1(1) + nHidden*res(2)
    w_stack = jnp.asarray(np.stack(sq_weights, axis=0), dtype=jnp.float32)
    w_bf = jnp.asarray(he_orthogonal_init_np(emb_atom, emb_bf, rng).T, dtype=jnp.float32)

    params = {
        "w_bf": w_bf,                                  # (emb_bf, emb_atom)
        "w_stack": w_stack,                            # (7, emb_atom, emb_atom)
        "scale": jnp.ones((1,), dtype=jnp.float32),    # ScalingFactor (scale_file=None)
    }

    key = jax.random.PRNGKey(0)
    kh, kb, ks, kt = jax.random.split(key, 4)
    h = jax.random.normal(kh, (n_atoms, emb_atom), dtype=jnp.float32)
    bf = jax.random.normal(kb, (n_edges, emb_bf), dtype=jnp.float32)
    idx_s = jax.random.randint(ks, (n_edges,), 0, n_atoms, dtype=jnp.int32)
    idx_t = jax.random.randint(kt, (n_edges,), 0, n_atoms, dtype=jnp.int32)

    # One-time host-side parameter prep (padding, scale folding, bf16 cast).
    prep = prepare_hadamard_params(params, emb_atom=emb_atom, emb_bf=emb_bf)

    out = hadamard_block(h, bf, idx_s, idx_t, prep, use_silu=use_silu)
    out = jax.block_until_ready(out)

    # Tight check: kernel vs. a reference applying the same bf16 rounding; the only
    # remaining differences are the EUP approximate reciprocal in silu and f32
    # accumulation order of the scatter.
    ref_mixed = hadamard_block_ref_mixed(h, bf, idx_s, idx_t, prep, use_silu=use_silu)
    np.testing.assert_allclose(np.asarray(out), np.asarray(ref_mixed),
                               rtol=3e-2, atol=3e-2)

    # Semantic check: kernel vs. the full-f32 module forward; tolerance covers the
    # bf16 MXU operands used throughout (per perf review).
    ref_f32 = hadamard_block_ref(h, bf, idx_s, idx_t, params,
                                 n_hidden=n_hidden, use_silu=use_silu)
    np.testing.assert_allclose(np.asarray(out), np.asarray(ref_f32),
                               rtol=6e-2, atol=2e-1)

    print("KERNEL_OK")
</pallas_src>

<mosaic_0001>
module attributes {stable_mosaic.version = 11 : i64} {
  func.func @atom_mlp_kernel(%arg0: i32, %arg1: memref<1x64x128xf32, #tpu.memory_space<vmem>>, %arg2: memref<2x128x128xbf16, #tpu.memory_space<vmem>>, %arg3: memref<64x128xbf16, #tpu.memory_space<vmem>>) attributes {dimension_semantics = [#tpu.dimension_semantics<parallel>], iteration_bounds = array<i64: 1>, scalar_prefetch = 0 : i64, scratch_operands = 0 : i64, tpu.core_type = #tpu.core_type<tc>, window_params = [{transform_indices = @transform_0, window_bounds = array<i64: 1, 64, 128>}, {pipeline_mode = #tpu.pipeline_mode<synchronous>, transform_indices = @transform_1, window_bounds = array<i64: 2, 128, 128>}, {transform_indices = @transform_2, window_bounds = array<i64: 64, 128>}]} {
    %c0 = arith.constant 0 : index
    %c0_0 = arith.constant 0 : index
    %c0_1 = arith.constant 0 : index
    %0 = vector.load %arg1[%c0, %c0_0, %c0_1] : memref<1x64x128xf32, #tpu.memory_space<vmem>>, vector<1x64x128xf32>
    %1 = vector.shape_cast %0 : vector<1x64x128xf32> to vector<64x128xf32>
    %2 = arith.truncf %1 : vector<64x128xf32> to vector<64x128xbf16>
    %c0_2 = arith.constant 0 : index
    %c0_3 = arith.constant 0 : index
    %c0_4 = arith.constant 0 : index
    %3 = vector.load %arg2[%c0_2, %c0_3, %c0_4] : memref<2x128x128xbf16, #tpu.memory_space<vmem>>, vector<1x128x128xbf16>
    %4 = vector.shape_cast %3 : vector<1x128x128xbf16> to vector<128x128xbf16>
    %cst = arith.constant dense<0.000000e+00> : vector<64x128xf32>
    %5 = tpu.matmul %2, %4, %cst {dimension_numbers = #tpu.dot_dimension_numbers<[1], [0], [0], [1], [0, 0, 1, 1], [], []>} : vector<64x128xbf16>, vector<128x128xbf16>, vector<64x128xf32> -> vector<64x128xf32>
    %cst_5 = arith.constant 0.000000e+00 : f32
    %6 = vector.broadcast %cst_5 : f32 to vector<64x128xf32>
    %7 = arith.subf %6, %5 : vector<64x128xf32>
    %8 = math.exp %7 : vector<64x128xf32>
    %cst_6 = arith.constant 1.000000e+00 : f32
    %9 = vector.broadcast %cst_6 : f32 to vector<64x128xf32>
    %10 = arith.addf %9, %8 : vector<64x128xf32>
    %11 = tpu.reciprocal %10 {approx = true} : vector<64x128xf32> -> vector<64x128xf32>
    %12 = arith.mulf %5, %11 : vector<64x128xf32>
    %13 = arith.truncf %12 : vector<64x128xf32> to vector<64x128xbf16>
    %c1 = arith.constant 1 : index
    %c0_7 = arith.constant 0 : index
    %c0_8 = arith.constant 0 : index
    %14 = vector.load %arg2[%c1, %c0_7, %c0_8] : memref<2x128x128xbf16, #tpu.memory_space<vmem>>, vector<1x128x128xbf16>
    %15 = vector.shape_cast %14 : vector<1x128x128xbf16> to vector<128x128xbf16>
    %cst_9 = arith.constant dense<0.000000e+00> : vector<64x128xf32>
    %16 = tpu.matmul %13, %15, %cst_9 {dimension_numbers = #tpu.dot_dimension_numbers<[1], [0], [0], [1], [0, 0, 1, 1], [], []>} : vector<64x128xbf16>, vector<128x128xbf16>, vector<64x128xf32> -> vector<64x128xf32>
    %cst_10 = arith.constant 0.000000e+00 : f32
    %17 = vector.broadcast %cst_10 : f32 to vector<64x128xf32>
    %18 = arith.subf %17, %16 : vector<64x128xf32>
    %19 = math.exp %18 : vector<64x128xf32>
    %cst_11 = arith.constant 1.000000e+00 : f32
    %20 = vector.broadcast %cst_11 : f32 to vector<64x128xf32>
    %21 = arith.addf %20, %19 : vector<64x128xf32>
    %22 = tpu.reciprocal %21 {approx = true} : vector<64x128xf32> -> vector<64x128xf32>
    %23 = arith.mulf %16, %22 : vector<64x128xf32>
    %24 = arith.addf %1, %23 : vector<64x128xf32>
    %25 = arith.truncf %24 : vector<64x128xf32> to vector<64x128xbf16>
    %c0_12 = arith.constant 0 : index
    %c0_13 = arith.constant 0 : index
    %26 = vector.load %arg3[%c0_12, %c0_13] : memref<64x128xbf16, #tpu.memory_space<vmem>>, vector<64x128xbf16>
    tpu.vector_store %arg3[%c0_12, %c0_13], %25 {strides = array<i32>} : memref<64x128xbf16, #tpu.memory_space<vmem>>, vector<64x128xbf16>,
    return
  }
  func.func @transform_0(%arg0: i32) -> (i32, i32, i32) {
    %c0_i32 = arith.constant 0 : i32
    %c0_i32_0 = arith.constant 0 : i32
    %c0_i32_1 = arith.constant 0 : i32
    return %c0_i32, %arg0, %c0_i32_0 : i32, i32, i32
  }
  func.func @transform_1(%arg0: i32) -> (i32, i32, i32) {
    %c0_i32 = arith.constant 0 : i32
    %c0_i32_0 = arith.constant 0 : i32
    %c0_i32_1 = arith.constant 0 : i32
    %c0_i32_2 = arith.constant 0 : i32
    return %c0_i32, %c0_i32_0, %c0_i32_1 : i32, i32, i32
  }
  func.func @transform_2(%arg0: i32) -> (i32, i32) {
    %c0_i32 = arith.constant 0 : i32
    %c0_i32_0 = arith.constant 0 : i32
    return %arg0, %c0_i32 : i32, i32
  }
}

module attributes {stable_mosaic.version = 11 : i64} {
  func.func @edge_scatter_kernel(%arg0: i32, %arg1: i32, %arg2: memref<64x128xbf16, #tpu.memory_space<vmem>>, %arg3: memref<128x16xbf16, #tpu.memory_space<vmem>>, %arg4: memref<128x1xi32, #tpu.memory_space<vmem>>, %arg5: memref<1x128xi32, #tpu.memory_space<vmem>>, %arg6: memref<16x128xbf16, #tpu.memory_space<vmem>>, %arg7: memref<1x64x128xf32, #tpu.memory_space<vmem>>) attributes {dimension_semantics = [#tpu.dimension_semantics<parallel>, #tpu.dimension_semantics<arbitrary>], iteration_bounds = array<i64: 2, 1>, scalar_prefetch = 0 : i64, scratch_operands = 0 : i64, tpu.core_type = #tpu.core_type<tc>, window_params = [{pipeline_mode = #tpu.pipeline_mode<synchronous>, transform_indices = @transform_0, window_bounds = array<i64: 64, 128>}, {transform_indices = @transform_1, window_bounds = array<i64: 128, 16>}, {transform_indices = @transform_2, window_bounds = array<i64: 128, 1>}, {transform_indices = @transform_3, window_bounds = array<i64: 1, 128>}, {pipeline_mode = #tpu.pipeline_mode<synchronous>, transform_indices = @transform_4, window_bounds = array<i64: 16, 128>}, {transform_indices = @transform_5, window_bounds = array<i64: 1, 64, 128>}]} {
    %c0_i32 = arith.constant 0 : i32
    %0 = arith.cmpi eq, %arg1, %c0_i32 : i32
    %1 = arith.extui %0 : i1 to i32
    %c0_i32_0 = arith.constant 0 : i32
    %2 = arith.cmpi ne, %1, %c0_i32_0 : i32
    scf.if %2 {
      %cst_18 = arith.constant 0.000000e+00 : f32
      %31 = vector.broadcast %cst_18 : f32 to vector<1x64x128xf32>
      %c0_19 = arith.constant 0 : index
      %c0_20 = arith.constant 0 : index
      %c0_21 = arith.constant 0 : index
      %32 = vector.load %arg7[%c0_19, %c0_20, %c0_21] : memref<1x64x128xf32, #tpu.memory_space<vmem>>, vector<1x64x128xf32>
      tpu.vector_store %arg7[%c0_19, %c0_20, %c0_21], %31 {strides = array<i32>} : memref<1x64x128xf32, #tpu.memory_space<vmem>>, vector<1x64x128xf32>,
    } else {
    }
    %c0 = arith.constant 0 : index
    %c0_1 = arith.constant 0 : index
    %3 = vector.load %arg3[%c0, %c0_1] : memref<128x16xbf16, #tpu.memory_space<vmem>>, vector<128x16xbf16>
    %c0_2 = arith.constant 0 : index
    %c0_3 = arith.constant 0 : index
    %4 = vector.load %arg6[%c0_2, %c0_3] : memref<16x128xbf16, #tpu.memory_space<vmem>>, vector<16x128xbf16>
    %cst = arith.constant dense<0.000000e+00> : vector<128x128xf32>
    %5 = tpu.matmul %3, %4, %cst {dimension_numbers = #tpu.dot_dimension_numbers<[1], [0], [0], [1], [0, 0, 1, 1], [], []>} : vector<128x16xbf16>, vector<16x128xbf16>, vector<128x128xf32> -> vector<128x128xf32>
    %6 = tpu.iota {dimensions = array<i32: 1>} : vector<128x64xi32>
    %c0_4 = arith.constant 0 : index
    %c0_5 = arith.constant 0 : index
    %7 = vector.load %arg4[%c0_4, %c0_5] : memref<128x1xi32, #tpu.memory_space<vmem>>, vector<128x1xi32>
    %8 = vector.broadcast %7 : vector<128x1xi32> to vector<128x64xi32>
    %9 = arith.cmpi eq, %8, %6 : vector<128x64xi32>
    %10 = arith.extui %9 : vector<128x64xi1> to vector<128x64xi32>
    %11 = arith.sitofp %10 : vector<128x64xi32> to vector<128x64xf32>
    %12 = arith.truncf %11 : vector<128x64xf32> to vector<128x64xbf16>
    %c0_6 = arith.constant 0 : index
    %c0_7 = arith.constant 0 : index
    %13 = vector.load %arg2[%c0_6, %c0_7] : memref<64x128xbf16, #tpu.memory_space<vmem>>, vector<64x128xbf16>
    %cst_8 = arith.constant dense<0.000000e+00> : vector<128x128xf32>
    %14 = tpu.matmul %12, %13, %cst_8 {dimension_numbers = #tpu.dot_dimension_numbers<[1], [0], [0], [1], [0, 0, 1, 1], [], []>} : vector<128x64xbf16>, vector<64x128xbf16>, vector<128x128xf32> -> vector<128x128xf32>
    %15 = arith.mulf %14, %5 : vector<128x128xf32>
    %16 = tpu.iota {dimensions = array<i32: 0>} : vector<64x128xi32>
    %c0_9 = arith.constant 0 : index
    %c0_10 = arith.constant 0 : index
    %17 = vector.load %arg5[%c0_9, %c0_10] : memref<1x128xi32, #tpu.memory_space<vmem>>, vector<1x128xi32>
    %18 = vector.broadcast %17 : vector<1x128xi32> to vector<64x128xi32>
    %19 = arith.cmpi eq, %16, %18 : vector<64x128xi32>
    %20 = arith.extui %19 : vector<64x128xi1> to vector<64x128xi32>
    %21 = arith.sitofp %20 : vector<64x128xi32> to vector<64x128xf32>
    %22 = arith.truncf %21 : vector<64x128xf32> to vector<64x128xbf16>
    %23 = arith.truncf %15 : vector<128x128xf32> to vector<128x128xbf16>
    %cst_11 = arith.constant dense<0.000000e+00> : vector<64x128xf32>
    %24 = tpu.matmul %22, %23, %cst_11 {dimension_numbers = #tpu.dot_dimension_numbers<[1], [0], [0], [1], [0, 0, 1, 1], [], []>} : vector<64x128xbf16>, vector<128x128xbf16>, vector<64x128xf32> -> vector<64x128xf32>
    %c0_12 = arith.constant 0 : index
    %c0_13 = arith.constant 0 : index
    %c0_14 = arith.constant 0 : index
    %25 = vector.load %arg7[%c0_12, %c0_13, %c0_14] : memref<1x64x128xf32, #tpu.memory_space<vmem>>, vector<1x64x128xf32>
    %26 = vector.shape_cast %25 : vector<1x64x128xf32> to vector<64x128xf32>
    %27 = arith.addf %26, %24 : vector<64x128xf32>
    %c0_15 = arith.constant 0 : index
    %c0_16 = arith.constant 0 : index
    %c0_17 = arith.constant 0 : index
    %28 = vector.load %arg7[%c0_15, %c0_16, %c0_17] : memref<1x64x128xf32, #tpu.memory_space<vmem>>, vector<1x64x128xf32>
    %29 = vector.shape_cast %28 : vector<1x64x128xf32> to vector<64x128xf32>
    %30 = vector.shape_cast %27 : vector<64x128xf32> to vector<1x64x128xf32>
    tpu.vector_store %arg7[%c0_15, %c0_16, %c0_17], %30 {strides = array<i32>} : memref<1x64x128xf32, #tpu.memory_space<vmem>>, vector<1x64x128xf32>,
    return
  }
  func.func @transform_0(%arg0: i32, %arg1: i32) -> (i32, i32) {
    %c0_i32 = arith.constant 0 : i32
    %c0_i32_0 = arith.constant 0 : i32
    %c0_i32_1 = arith.constant 0 : i32
    return %c0_i32, %c0_i32_0 : i32, i32
  }
  func.func @transform_1(%arg0: i32, %arg1: i32) -> (i32, i32) {
    %c1_i32 = arith.constant 1 : i32
    %0 = arith.muli %arg0, %c1_i32 : i32
    %1 = arith.addi %0, %arg1 : i32
    %c0_i32 = arith.constant 0 : i32
    %c0_i32_0 = arith.constant 0 : i32
    return %1, %c0_i32 : i32, i32
  }
  func.func @transform_2(%arg0: i32, %arg1: i32) -> (i32, i32) {
    %c1_i32 = arith.constant 1 : i32
    %0 = arith.muli %arg0, %c1_i32 : i32
    %1 = arith.addi %0, %arg1 : i32
    %c0_i32 = arith.constant 0 : i32
    %c0_i32_0 = arith.constant 0 : i32
    return %1, %c0_i32 : i32, i32
  }
  func.func @transform_3(%arg0: i32, %arg1: i32) -> (i32, i32) {
    %c1_i32 = arith.constant 1 : i32
    %0 = arith.muli %arg0, %c1_i32 : i32
    %1 = arith.addi %0, %arg1 : i32
    %c0_i32 = arith.constant 0 : i32
    %c0_i32_0 = arith.constant 0 : i32
    return %c0_i32, %1 : i32, i32
  }
  func.func @transform_4(%arg0: i32, %arg1: i32) -> (i32, i32) {
    %c0_i32 = arith.constant 0 : i32
    %c0_i32_0 = arith.constant 0 : i32
    %c0_i32_1 = arith.constant 0 : i32
    return %c0_i32, %c0_i32_0 : i32, i32
  }
  func.func @transform_5(%arg0: i32, %arg1: i32) -> (i32, i32, i32) {
    %c0_i32 = arith.constant 0 : i32
    %c0_i32_0 = arith.constant 0 : i32
    %c0_i32_1 = arith.constant 0 : i32
    return %arg0, %c0_i32, %c0_i32_0 : i32, i32, i32
  }
}

module attributes {stable_mosaic.version = 11 : i64} {
  func.func @atom_mlp_kernel(%arg0: i32, %arg1: memref<2x64x128xf32, #tpu.memory_space<vmem>>, %arg2: memref<5x128x128xbf16, #tpu.memory_space<vmem>>, %arg3: memref<64x128xf32, #tpu.memory_space<vmem>>) attributes {dimension_semantics = [#tpu.dimension_semantics<parallel>], iteration_bounds = array<i64: 1>, scalar_prefetch = 0 : i64, scratch_operands = 0 : i64, tpu.core_type = #tpu.core_type<tc>, window_params = [{transform_indices = @transform_0, window_bounds = array<i64: 2, 64, 128>}, {pipeline_mode = #tpu.pipeline_mode<synchronous>, transform_indices = @transform_1, window_bounds = array<i64: 5, 128, 128>}, {transform_indices = @transform_2, window_bounds = array<i64: 64, 128>}]} {
    %c0 = arith.constant 0 : index
    %c0_0 = arith.constant 0 : index
    %c0_1 = arith.constant 0 : index
    %0 = vector.load %arg1[%c0, %c0_0, %c0_1] : memref<2x64x128xf32, #tpu.memory_space<vmem>>, vector<1x64x128xf32>
    %1 = vector.shape_cast %0 : vector<1x64x128xf32> to vector<64x128xf32>
    %c1 = arith.constant 1 : index
    %c0_2 = arith.constant 0 : index
    %c0_3 = arith.constant 0 : index
    %2 = vector.load %arg1[%c1, %c0_2, %c0_3] : memref<2x64x128xf32, #tpu.memory_space<vmem>>, vector<1x64x128xf32>
    %3 = vector.shape_cast %2 : vector<1x64x128xf32> to vector<64x128xf32>
    %4 = arith.addf %1, %3 : vector<64x128xf32>
    %5 = arith.truncf %4 : vector<64x128xf32> to vector<64x128xbf16>
    %c0_4 = arith.constant 0 : index
    %c0_5 = arith.constant 0 : index
    %c0_6 = arith.constant 0 : index
    %6 = vector.load %arg2[%c0_4, %c0_5, %c0_6] : memref<5x128x128xbf16, #tpu.memory_space<vmem>>, vector<1x128x128xbf16>
    %7 = vector.shape_cast %6 : vector<1x128x128xbf16> to vector<128x128xbf16>
    %cst = arith.constant dense<0.000000e+00> : vector<64x128xf32>
    %8 = tpu.matmul %5, %7, %cst {dimension_numbers = #tpu.dot_dimension_numbers<[1], [0], [0], [1], [0, 0, 1, 1], [], []>} : vector<64x128xbf16>, vector<128x128xbf16>, vector<64x128xf32> -> vector<64x128xf32>
    %cst_7 = arith.constant 0.000000e+00 : f32
    %9 = vector.broadcast %cst_7 : f32 to vector<64x128xf32>
    %10 = arith.subf %9, %8 : vector<64x128xf32>
    %11 = math.exp %10 : vector<64x128xf32>
    %cst_8 = arith.constant 1.000000e+00 : f32
    %12 = vector.broadcast %cst_8 : f32 to vector<64x128xf32>
    %13 = arith.addf %12, %11 : vector<64x128xf32>
    %14 = tpu.reciprocal %13 {approx = true} : vector<64x128xf32> -> vector<64x128xf32>
    %15 = arith.mulf %8, %14 : vector<64x128xf32>
    %16 = arith.truncf %15 : vector<64x128xf32> to vector<64x128xbf16>
    %c1_9 = arith.constant 1 : index
    %c0_10 = arith.constant 0 : index
    %c0_11 = arith.constant 0 : index
    %17 = vector.load %arg2[%c1_9, %c0_10, %c0_11] : memref<5x128x128xbf16, #tpu.memory_space<vmem>>, vector<1x128x128xbf16>
    %18 = vector.shape_cast %17 : vector<1x128x128xbf16> to vector<128x128xbf16>
    %cst_12 = arith.constant dense<0.000000e+00> : vector<64x128xf32>
    %19 = tpu.matmul %16, %18, %cst_12 {dimension_numbers = #tpu.dot_dimension_numbers<[1], [0], [0], [1], [0, 0, 1, 1], [], []>} : vector<64x128xbf16>, vector<128x128xbf16>, vector<64x128xf32> -> vector<64x128xf32>
    %cst_13 = arith.constant 0.000000e+00 : f32
    %20 = vector.broadcast %cst_13 : f32 to vector<64x128xf32>
    %21 = arith.subf %20, %19 : vector<64x128xf32>
    %22 = math.exp %21 : vector<64x128xf32>
    %cst_14 = arith.constant 1.000000e+00 : f32
    %23 = vector.broadcast %cst_14 : f32 to vector<64x128xf32>
    %24 = arith.addf %23, %22 : vector<64x128xf32>
    %25 = tpu.reciprocal %24 {approx = true} : vector<64x128xf32> -> vector<64x128xf32>
    %26 = arith.mulf %19, %25 : vector<64x128xf32>
    %27 = arith.truncf %26 : vector<64x128xf32> to vector<64x128xbf16>
    %c2 = arith.constant 2 : index
    %c0_15 = arith.constant 0 : index
    %c0_16 = arith.constant 0 : index
    %28 = vector.load %arg2[%c2, %c0_15, %c0_16] : memref<5x128x128xbf16, #tpu.memory_space<vmem>>, vector<1x128x128xbf16>
    %29 = vector.shape_cast %28 : vector<1x128x128xbf16> to vector<128x128xbf16>
    %cst_17 = arith.constant dense<0.000000e+00> : vector<64x128xf32>
    %30 = tpu.matmul %27, %29, %cst_17 {dimension_numbers = #tpu.dot_dimension_numbers<[1], [0], [0], [1], [0, 0, 1, 1], [], []>} : vector<64x128xbf16>, vector<128x128xbf16>, vector<64x128xf32> -> vector<64x128xf32>
    %cst_18 = arith.constant 0.000000e+00 : f32
    %31 = vector.broadcast %cst_18 : f32 to vector<64x128xf32>
    %32 = arith.subf %31, %30 : vector<64x128xf32>
    %33 = math.exp %32 : vector<64x128xf32>
    %cst_19 = arith.constant 1.000000e+00 : f32
    %34 = vector.broadcast %cst_19 : f32 to vector<64x128xf32>
    %35 = arith.addf %34, %33 : vector<64x128xf32>
    %36 = tpu.reciprocal %35 {approx = true} : vector<64x128xf32> -> vector<64x128xf32>
    %37 = arith.mulf %30, %36 : vector<64x128xf32>
    %38 = arith.addf %15, %37 : vector<64x128xf32>
    %39 = arith.truncf %38 : vector<64x128xf32> to vector<64x128xbf16>
    %c3 = arith.constant 3 : index
    %c0_20 = arith.constant 0 : index
    %c0_21 = arith.constant 0 : index
    %40 = vector.load %arg2[%c3, %c0_20, %c0_21] : memref<5x128x128xbf16, #tpu.memory_space<vmem>>, vector<1x128x128xbf16>
    %41 = vector.shape_cast %40 : vector<1x128x128xbf16> to vector<128x128xbf16>
    %cst_22 = arith.constant dense<0.000000e+00> : vector<64x128xf32>
    %42 = tpu.matmul %39, %41, %cst_22 {dimension_numbers = #tpu.dot_dimension_numbers<[1], [0], [0], [1], [0, 0, 1, 1], [], []>} : vector<64x128xbf16>, vector<128x128xbf16>, vector<64x128xf32> -> vector<64x128xf32>
    %cst_23 = arith.constant 0.000000e+00 : f32
    %43 = vector.broadcast %cst_23 : f32 to vector<64x128xf32>
    %44 = arith.subf %43, %42 : vector<64x128xf32>
    %45 = math.exp %44 : vector<64x128xf32>
    %cst_24 = arith.constant 1.000000e+00 : f32
    %46 = vector.broadcast %cst_24 : f32 to vector<64x128xf32>
    %47 = arith.addf %46, %45 : vector<64x128xf32>
    %48 = tpu.reciprocal %47 {approx = true} : vector<64x128xf32> -> vector<64x128xf32>
    %49 = arith.mulf %42, %48 : vector<64x128xf32>
    %50 = arith.truncf %49 : vector<64x128xf32> to vector<64x128xbf16>
    %c4 = arith.constant 4 : index
    %c0_25 = arith.constant 0 : index
    %c0_26 = arith.constant 0 : index
    %51 = vector.load %arg2[%c4, %c0_25, %c0_26] : memref<5x128x128xbf16, #tpu.memory_space<vmem>>, vector<1x128x128xbf16>
    %52 = vector.shape_cast %51 : vector<1x128x128xbf16> to vector<128x128xbf16>
    %cst_27 = arith.constant dense<0.000000e+00> : vector<64x128xf32>
    %53 = tpu.matmul %50, %52, %cst_27 {dimension_numbers = #tpu.dot_dimension_numbers<[1], [0], [0], [1], [0, 0, 1, 1], [], []>} : vector<64x128xbf16>, vector<128x128xbf16>, vector<64x128xf32> -> vector<64x128xf32>
    %cst_28 = arith.constant 0.000000e+00 : f32
    %54 = vector.broadcast %cst_28 : f32 to vector<64x128xf32>
    %55 = arith.subf %54, %53 : vector<64x128xf32>
    %56 = math.exp %55 : vector<64x128xf32>
    %cst_29 = arith.constant 1.000000e+00 : f32
    %57 = vector.broadcast %cst_29 : f32 to vector<64x128xf32>
    %58 = arith.addf %57, %56 : vector<64x128xf32>
    %59 = tpu.reciprocal %58 {approx = true} : vector<64x128xf32> -> vector<64x128xf32>
    %60 = arith.mulf %53, %59 : vector<64x128xf32>
    %61 = arith.addf %38, %60 : vector<64x128xf32>
    %c0_30 = arith.constant 0 : index
    %c0_31 = arith.constant 0 : index
    %62 = vector.load %arg3[%c0_30, %c0_31] : memref<64x128xf32, #tpu.memory_space<vmem>>, vector<64x128xf32>
    tpu.vector_store %arg3[%c0_30, %c0_31], %61 {strides = array<i32>} : memref<64x128xf32, #tpu.memory_space<vmem>>, vector<64x128xf32>,
    return
  }
  func.func @transform_0(%arg0: i32) -> (i32, i32, i32) {
    %c0_i32 = arith.constant 0 : i32
    %c0_i32_0 = arith.constant 0 : i32
    %c0_i32_1 = arith.constant 0 : i32
    return %c0_i32, %arg0, %c0_i32_0 : i32, i32, i32
  }
  func.func @transform_1(%arg0: i32) -> (i32, i32, i32) {
    %c0_i32 = arith.constant 0 : i32
    %c0_i32_0 = arith.constant 0 : i32
    %c0_i32_1 = arith.constant 0 : i32
    %c0_i32_2 = arith.constant 0 : i32
    return %c0_i32, %c0_i32_0, %c0_i32_1 : i32, i32, i32
  }
  func.func @transform_2(%arg0: i32) -> (i32, i32) {
    %c0_i32 = arith.constant 0 : i32
    %c0_i32_0 = arith.constant 0 : i32
    return %arg0, %c0_i32 : i32, i32
  }
}

</mosaic_0001>

<bundles_post_ra>
// kernel: hadamard_block_fwd.3
= control target key start
LH: loop header
LB: loop body
LE: loop exit
PB: predicated region body
PF: predicated region fallthrough
CT: control target
= control target key end

     0   :  { %s789_s1 = inlined_call_operand.vmem [shape: bf16[2,128,128], index: 1, kind: input, shape index: {}]   ;;  %s790_s0 = inlined_call_operand.vmem [shape: f32[1,64,128], index: 0, kind: input, shape index: {}]   ;;  %s791_s2 = inlined_call_operand.vmem [shape: bf16[64,128], index: 2, kind: output, shape index: {}]  }
   0x1   :  { %v578_v0 = vld [vmem:[%s789_s1] sm:$0xff]   ;;  %v579_v1 = vld [vmem:[%s789_s1 + $0x8] sm:$0xff]   ;;  %v580_v2 = vld [vmem:[%s789_s1 + $0x10] sm:$0xff]  }
   0x2   :  { %530 = vmatprep.subr.bf16.mxu0 %v578_v0  ;;  %v581_v3 = vld [vmem:[%s789_s1 + $0x18] sm:$0xff]   ;;  %v688_v4 = vld [vmem:[%s790_s0] sm:$0xff]  ;;  %v693_v5 = vld [vmem:[%s790_s0 + $0x8] sm:$0xff] }
   0x3   :  { %531 = vmatpush3.bf16.msra.mxu0 %v578_v0  ;;  %v20_v6 = vpack.c.bf16 %v693_v5, %v688_v4  ;;  %v582_v7 = vld [vmem:[%s789_s1 + $0x20] sm:$0xff]   ;;  %v583_v8 = vld [vmem:[%s789_s1 + $0x28] sm:$0xff]   ;;  %v584_v9 = vld [vmem:[%s789_s1 + $0x30] sm:$0xff]  }
   0x4   :  { %532 = vmatprep.subr.bf16.mxu0 %v579_v1  ;;  %v585_v10 = vld [vmem:[%s789_s1 + $0x38] sm:$0xff]   ;;  %v712_v11 = vld [vmem:[%s790_s0 + $0x10] sm:$0xff]  ;;  %v722_v13 = vld [vmem:[%s790_s0 + $0x20] sm:$0xff] }
   0x5   :  { %546 = vmatprep.mubr.bf16.mxu0 %v20_v6  ;;  %v717_v12 = vld [vmem:[%s790_s0 + $0x18] sm:$0xff]  ;;  %v727_v14 = vld [vmem:[%s790_s0 + $0x28] sm:$0xff]  ;;  %v736_v17 = vld [vmem:[%s790_s0 + $0x30] sm:$0xff] }
   0x6   :  { %v21_v15 = vpack.c.bf16 %v717_v12, %v712_v11  ;;  %v22_v16 = vpack.c.bf16 %v727_v14, %v722_v13  ;;  %v741_v18 = vld [vmem:[%s790_s0 + $0x38] sm:$0xff]  ;;  %v586_v20 = vld [vmem:[%s789_s1 + $0x40] sm:$0xff]   ;;  %v587_v21 = vld [vmem:[%s789_s1 + $0x48] sm:$0xff]  }
   0x7   :  { %533 = vmatpush3.bf16.msra.mxu0 %v579_v1  ;;  %v23_v19 = vpack.c.bf16 %v741_v18, %v736_v17  ;;  %554 = vmatprep.subr.bf16.mxu1 %v586_v20  ;;  %v588_v22 = vld [vmem:[%s789_s1 + $0x50] sm:$0xff]   ;;  %v589_v23 = vld [vmem:[%s789_s1 + $0x58] sm:$0xff]   ;;  %v590_v24 = vld [vmem:[%s789_s1 + $0x60] sm:$0xff]  }
   0x8   :  { %534 = vmatprep.subr.bf16.mxu0 %v580_v2  ;;  %555 = vmatpush3.bf16.msra.mxu1 %v586_v20  ;;  %v591_v25 = vld [vmem:[%s789_s1 + $0x68] sm:$0xff]   ;;  %v592_v26 = vld [vmem:[%s789_s1 + $0x70] sm:$0xff]   ;;  %v593_v27 = vld [vmem:[%s789_s1 + $0x78] sm:$0xff]  }
   0x9   :  { %556 = vmatprep.subr.bf16.mxu1 %v587_v21 }
   0xb   :  { %535 = vmatpush3.bf16.msra.mxu0 %v580_v2 }
   0xc   :  { %536 = vmatprep.subr.bf16.mxu0 %v581_v3  ;;  %557 = vmatpush3.bf16.msra.mxu1 %v587_v21 }
   0xd   :  { %558 = vmatprep.subr.bf16.mxu1 %v588_v22 }
   0xf   :  { %537 = vmatpush3.bf16.msra.mxu0 %v581_v3 }
  0x10   :  { %538 = vmatprep.subr.bf16.mxu0 %v582_v7  ;;  %559 = vmatpush3.bf16.msra.mxu1 %v588_v22 }
  0x11   :  { %560 = vmatprep.subr.bf16.mxu1 %v589_v23 }
  0x13   :  { %539 = vmatpush3.bf16.msra.mxu0 %v582_v7 }
  0x14   :  { %540 = vmatprep.subr.bf16.mxu0 %v583_v8  ;;  %561 = vmatpush3.bf16.msra.mxu1 %v589_v23 }
  0x15   :  { %562 = vmatprep.subr.bf16.mxu1 %v590_v24 }
  0x17   :  { %541 = vmatpush3.bf16.msra.mxu0 %v583_v8 }
  0x18   :  { %542 = vmatprep.subr.bf16.mxu0 %v584_v9  ;;  %563 = vmatpush3.bf16.msra.mxu1 %v590_v24 }
  0x19   :  { %564 = vmatprep.subr.bf16.mxu1 %v591_v25 }
  0x1b   :  { %543 = vmatpush3.bf16.msra.mxu0 %v584_v9 }
  0x1c   :  { %544 = vmatprep.subr.bf16.mxu0 %v585_v10  ;;  %565 = vmatpush3.bf16.msra.mxu1 %v591_v25 }
  0x1d   :  { %566 = vmatprep.subr.bf16.mxu1 %v592_v26 }
  0x1f   :  { %545 = vmatpush3.bf16.msra.mxu0 %v585_v10 }
  0x20   :  { %567 = vmatpush3.bf16.msra.mxu1 %v592_v26 }
  0x21   :  { %568 = vmatprep.subr.bf16.mxu1 %v593_v27 }
  0x22   :  { %547 = vmatmul.mubr.bf16.vlgmr.msra.gmra.mrb[0].mxu0 %v21_v15 }
  0x23   :  { %550 = vmatprep.mubr.bf16.mxu0 %v22_v16 }
  0x24   :  { %569 = vmatpush3.bf16.msra.mxu1 %v593_v27 }
  0x2a   :  { %551 = vmatmul.mubr.bf16.gmra.mrb[4].mxu0 %v23_v19 }
  0xf5   :  { %v548_v28 = vpop.f32.mrb[0].mxu0 }
  0xf6   :  { %v155_v29 = vsub.f32 0.0, %v548_v28  ;;  %v122_v30 = vpop.f32.mrb[1].mxu0 }
  0xf7   :  { %v153_v31 = vsub.f32 0.0, %v122_v30  ;;  %v549_v32 = vpop.f32.mrb[2].mxu0 }
  0xf8   :  { %v165_v33 = vmul.f32 1.442695, %v155_v29  ;;  %v156_v34 = vsub.f32 0.0, %v549_v32  ;;  %v125_v35 = vpop.f32.mrb[3].mxu0 }
  0xf9   :  { %v161_v36 = vmul.f32 1.442695, %v153_v31  ;;  %v154_v37 = vsub.f32 0.0, %v125_v35 }
  0xfa   :  { %594 = vpow2.f32 %v165_v33  ;;  %v167_v38 = vmul.f32 1.442695, %v156_v34 }
  0xfb   :  { %596 = vpow2.f32 %v161_v36  ;;  %v163_v39 = vmul.f32 1.442695, %v154_v37 }
  0xfc   :  { %598 = vpow2.f32 %v167_v38 }
  0xfd   :  { %600 = vpow2.f32 %v163_v39  ;;  %v552_v40 = vpop.f32.mrb[4].mxu0 }
  0xfe   :  { %v159_v41 = vsub.f32 0.0, %v552_v40  ;;  %v138_v42 = vpop.f32.mrb[5].mxu0 }
  0xff   :  { %v157_v43 = vsub.f32 0.0, %v138_v42  ;;  %v553_v44 = vpop.f32.mrb[6].mxu0 }
 0x100   :  { %v173_v45 = vmul.f32 1.442695, %v159_v41  ;;  %v160_v46 = vsub.f32 0.0, %v553_v44  ;;  %v141_v47 = vpop.f32.mrb[7].mxu0 }
 0x101   :  { %v169_v48 = vmul.f32 1.442695, %v157_v43  ;;  %v158_v49 = vsub.f32 0.0, %v141_v47 }
 0x102   :  { %602 = vpow2.f32 %v173_v45  ;;  %v175_v50 = vmul.f32 1.442695, %v160_v46 }
 0x103   :  { %604 = vpow2.f32 %v169_v48  ;;  %v171_v51 = vmul.f32 1.442695, %v158_v49 }
 0x104   :  { %v595_v52 = vpop.eup %594  ;;  %606 = vpow2.f32 %v175_v50 }
 0x105   :  { %v597_v53 = vpop.eup %596  ;;  %v179_v54 = vadd.f32 1.0, %v595_v52  ;;  %608 = vpow2.f32 %v171_v51 }
 0x106   :  { %v599_v55 = vpop.eup %598  ;;  %v177_v56 = vadd.f32 1.0, %v597_v53 }
 0x107   :  { %v601_v57 = vpop.eup %600  ;;  %610 = vrcp.f32 %v179_v54  ;;  %v180_v58 = vadd.f32 1.0, %v599_v55 }
 0x108   :  { %612 = vrcp.f32 %v177_v56  ;;  %v178_v59 = vadd.f32 1.0, %v601_v57 }
 0x109   :  { %614 = vrcp.f32 %v180_v58 }
 0x10a   :  { %616 = vrcp.f32 %v178_v59 }
 0x10c   :  { %v603_v60 = vpop.eup %602 }
 0x10d   :  { %v605_v61 = vpop.eup %604  ;;  %v183_v62 = vadd.f32 1.0, %v603_v60 }
 0x10e   :  { %v607_v63 = vpop.eup %606  ;;  %v181_v0 = vadd.f32 1.0, %v605_v61 }
 0x10f   :  { %v609_v1 = vpop.eup %608  ;;  %618 = vrcp.f32 %v183_v62  ;;  %v184_v2 = vadd.f32 1.0, %v607_v63 }
 0x110   :  { %620 = vrcp.f32 %v181_v0  ;;  %v182_v3 = vadd.f32 1.0, %v609_v1 }
 0x111   :  { %v611_v6 = vpop.eup %610  ;;  %622 = vrcp.f32 %v184_v2 }
 0x112   :  { %v613_v7 = vpop.eup %612  ;;  %624 = vrcp.f32 %v182_v3  ;;  %v195_v10 = vmul.f32 %v611_v6, %v548_v28 }
 0x113   :  { %v615_v8 = vpop.eup %614  ;;  %v193_v16 = vmul.f32 %v613_v7, %v122_v30 }
 0x114   :  { %v617_v9 = vpop.eup %616  ;;  %v196_v15 = vmul.f32 %v615_v8, %v549_v32 }
 0x115   :  { %v194_v19 = vmul.f32 %v617_v9, %v125_v35 }
 0x116   :  { %v202_v20 = vpack.c.bf16 %v196_v15, %v195_v10 }
 0x117   :  { %v201_v21 = vpack.c.bf16 %v194_v19, %v193_v16 }
 0x119   :  { %v619_v22 = vpop.eup %618  ;;  %570 = vmatprep.mubr.bf16.mxu1 %v201_v21 }
 0x11a   :  { %v621_v23 = vpop.eup %620  ;;  %571 = vmatmul.mubr.bf16.vlgmr.msra.gmra.mrb[0].mxu1 %v202_v20  ;;  %v199_v26 = vmul.f32 %v619_v22, %v552_v40 }
 0x11b   :  { %v623_v24 = vpop.eup %622  ;;  %v197_v29 = vmul.f32 %v621_v23, %v138_v42 }
 0x11c   :  { %v625_v25 = vpop.eup %624  ;;  %v200_v27 = vmul.f32 %v623_v24, %v553_v44 }
 0x11d   :  { %v198_v31 = vmul.f32 %v625_v25, %v141_v47 }
 0x11e   :  { %v204_v33 = vpack.c.bf16 %v200_v27, %v199_v26 }
 0x11f   :  { %v203_v34 = vpack.c.bf16 %v198_v31, %v197_v29 }
 0x121   :  { %574 = vmatprep.mubr.bf16.mxu1 %v203_v34 }
 0x122   :  { %575 = vmatmul.mubr.bf16.gmra.mrb[4].mxu1 %v204_v33 }
 0x1ed   :  { %v572_v28 = vpop.f32.mrb[0].mxu1 }
 0x1ee   :  { %v337_v32 = vsub.f32 0.0, %v572_v28  ;;  %v304_v30 = vpop.f32.mrb[1].mxu1 }
 0x1ef   :  { %v335_v35 = vsub.f32 0.0, %v304_v30  ;;  %v573_v36 = vpop.f32.mrb[2].mxu1 }
 0x1f0   :  { %v347_v37 = vmul.f32 1.442695, %v337_v32  ;;  %v338_v38 = vsub.f32 0.0, %v573_v36  ;;  %v307_v39 = vpop.f32.mrb[3].mxu1 }
 0x1f1   :  { %v343_v41 = vmul.f32 1.442695, %v335_v35  ;;  %v336_v43 = vsub.f32 0.0, %v307_v39 }
 0x1f2   :  { %626 = vpow2.f32 %v347_v37  ;;  %v349_v45 = vmul.f32 1.442695, %v338_v38 }
 0x1f3   :  { %628 = vpow2.f32 %v343_v41  ;;  %v345_v40 = vmul.f32 1.442695, %v336_v43 }
 0x1f4   :  { %630 = vpow2.f32 %v349_v45 }
 0x1f5   :  { %632 = vpow2.f32 %v345_v40  ;;  %v576_v42 = vpop.f32.mrb[4].mxu1 }
 0x1f6   :  { %v341_v44 = vsub.f32 0.0, %v576_v42  ;;  %v320_v46 = vpop.f32.mrb[5].mxu1 }
 0x1f7   :  { %v339_v47 = vsub.f32 0.0, %v320_v46  ;;  %v577_v48 = vpop.f32.mrb[6].mxu1 }
 0x1f8   :  { %v355_v49 = vmul.f32 1.442695, %v341_v44  ;;  %v342_v50 = vsub.f32 0.0, %v577_v48  ;;  %v323_v51 = vpop.f32.mrb[7].mxu1 }
 0x1f9   :  { %v351_v52 = vmul.f32 1.442695, %v339_v47  ;;  %v340_v53 = vsub.f32 0.0, %v323_v51 }
 0x1fa   :  { %634 = vpow2.f32 %v355_v49  ;;  %v357_v54 = vmul.f32 1.442695, %v342_v50 }
 0x1fb   :  { %636 = vpow2.f32 %v351_v52  ;;  %v353_v55 = vmul.f32 1.442695, %v340_v53 }
 0x1fc   :  { %v627_v56 = vpop.eup %626  ;;  %638 = vpow2.f32 %v357_v54 }
 0x1fd   :  { %v629_v57 = vpop.eup %628  ;;  %v361_v58 = vadd.f32 1.0, %v627_v56  ;;  %640 = vpow2.f32 %v353_v55 }
 0x1fe   :  { %v631_v59 = vpop.eup %630  ;;  %v359_v60 = vadd.f32 1.0, %v629_v57 }
 0x1ff   :  { %v633_v61 = vpop.eup %632  ;;  %642 = vrcp.f32 %v361_v58  ;;  %v362_v62 = vadd.f32 1.0, %v631_v59 }
 0x200   :  { %644 = vrcp.f32 %v359_v60  ;;  %v360_v63 = vadd.f32 1.0, %v633_v61 }
 0x201   :  { %646 = vrcp.f32 %v362_v62 }
 0x202   :  { %648 = vrcp.f32 %v360_v63 }
 0x204   :  { %v635_v0 = vpop.eup %634 }
 0x205   :  { %v637_v1 = vpop.eup %636  ;;  %v365_v2 = vadd.f32 1.0, %v635_v0 }
 0x206   :  { %v639_v3 = vpop.eup %638  ;;  %v363_v6 = vadd.f32 1.0, %v637_v1 }
 0x207   :  { %v641_v7 = vpop.eup %640  ;;  %650 = vrcp.f32 %v365_v2  ;;  %v366_v8 = vadd.f32 1.0, %v639_v3 }
 0x208   :  { %652 = vrcp.f32 %v363_v6  ;;  %v364_v9 = vadd.f32 1.0, %v641_v7 }
 0x209   :  { %v643_v10 = vpop.eup %642  ;;  %654 = vrcp.f32 %v366_v8 }
 0x20a   :  { %v645_v15 = vpop.eup %644  ;;  %v377_v16 = vmul.f32 %v643_v10, %v572_v28  ;;  %656 = vrcp.f32 %v364_v9 }
 0x20b   :  { %v647_v19 = vpop.eup %646  ;;  %v375_v20 = vmul.f32 %v645_v15, %v304_v30 }
 0x20c   :  { %v649_v21 = vpop.eup %648  ;;  %v378_v22 = vmul.f32 %v647_v19, %v573_v36  ;;  %v385_v24 = vadd.f32 %v377_v16, %v712_v11 }
 0x20d   :  { %v376_v23 = vmul.f32 %v649_v21, %v307_v39  ;;  %v383_v26 = vadd.f32 %v375_v20, %v688_v4 }
 0x20e   :  { %v386_v25 = vadd.f32 %v378_v22, %v717_v12 }
 0x20f   :  { %v384_v27 = vadd.f32 %v376_v23, %v693_v5 }
 0x210   :  { %v491_v29 = vpack.c.bf16 %v386_v25, %v385_v24 }
 0x211   :  { %v651_v31 = vpop.eup %650  ;;  %v486_v33 = vpack.c.bf16 %v384_v27, %v383_v26 }
 0x212   :  { %v653_v34 = vpop.eup %652  ;;  %503 = vst [vmem:[%s791_s2 + $0x8] sm:$0xff] %v491_v29   ;;  %v381_v28 = vmul.f32 %v651_v31, %v576_v42 }
 0x213   :  { %v655_v32 = vpop.eup %654  ;;  %487 = vst [vmem:[%s791_s2] sm:$0xff] %v486_v33   ;;  %v379_v11 = vmul.f32 %v653_v34, %v320_v46 }
 0x214   :  { %v657_v12 = vpop.eup %656  ;;  %v382_v30 = vmul.f32 %v655_v32, %v577_v48  ;;  %v389_v5 = vadd.f32 %v381_v28, %v736_v17 }
 0x215   :  { %v380_v4 = vmul.f32 %v657_v12, %v323_v51  ;;  %v387_v36 = vadd.f32 %v379_v11, %v722_v13 }
 0x216   :  { %v390_v35 = vadd.f32 %v382_v30, %v741_v18 }
 0x217   :  { %v388_v37 = vadd.f32 %v380_v4, %v727_v14 }
 0x218   :  { %v501_v38 = vpack.c.bf16 %v390_v35, %v389_v5 }
 0x219   :  { %v496_v39 = vpack.c.bf16 %v388_v37, %v387_v36 }
 0x21a   :  { %505 = vst [vmem:[%s791_s2 + $0x18] sm:$0xff] %v501_v38  }
 0x21b   :  { %504 = vst [vmem:[%s791_s2 + $0x10] sm:$0xff] %v496_v39  }

// kernel: hadamard_block_fwd.4
= control target key start
LH: loop header
LB: loop body
LE: loop exit
PB: predicated region body
PF: predicated region fallthrough
CT: control target
= control target key end

     0   :  { %s1284_s18 = smov 0   ;;  %s1286_s19 = smov 0   ;;  %s1451_s0 = inlined_call_operand.vmem [shape: bf16[64,128], index: 0, kind: input, shape index: {}]   ;;  %s1452_s1 = inlined_call_operand.vmem [shape: bf16[256,16], index: 1, kind: input, shape index: {}]   ;;  %s1453_s2 = inlined_call_operand.vmem [shape: s32[256,1], index: 2, kind: input, shape index: {}]   ;;  %s1454_s3 = inlined_call_operand.vmem [shape: s32[1,256], index: 3, kind: input, shape index: {}]   ;;  %s1455_s4 = inlined_call_operand.vmem [shape: bf16[16,128], index: 4, kind: input, shape index: {}]   ;;  %s1456_s5 = inlined_call_operand.vmem [shape: f32[2,64,128], index: 5, kind: output, shape index: {}]  }
   0x1   :  { %s1288_s20 = smov 0  }
   0x2 LB: > { %s27_s21 = sadd.s32 1, %s1245_s19  ;;  %p1014_p0 = scmp.ge.s32.totalorder %s1249_s20, 1  ;;  %s1249_s20 = sphi %s1288_s20, %s15_s20   ;;  %s1245_s19 = sphi %s1286_s19, %s1464_s19   ;;  %s1241_s18 = sphi %s1284_s18, %s1463_s18  }
   0x3   : > { %p29_p1 = scmp.ge.s32.totalorder %s27_s21, 2  ;;  %p231_p2 = scmp.lt.s32.totalorder %s1249_s20, 3 }
   0x5   : > { %s1466_s21 = smov (%p29_p1, %s27_s21), 0  ;;  %p232_p3 = pnand %p1014_p0, %p231_p2 }
   0x6   : > { %s1015_s22 = sshll.u32 (!%p232_p3), %s1241_s18, 4  ;;  %v1251_v0 = vmov (!%p232_p3), 0   ;;  %v1214_v1 = vld [vmem:[%s1451_s0] sm:$0xff] (!%p232_p3)   ;;  %v1215_v2 = vld [vmem:[%s1451_s0 + $0x8] sm:$0xff] (!%p232_p3)   ;;  %v1216_v9 = vld [vmem:[%s1451_s0 + $0x10] sm:$0xff] (!%p232_p3)   ;;  %vm373_vm0 = vcmask (!%p232_p3), 130048   ;;  %v495_v30 = vlaneseq (!%p232_p3) }
   0x7   : > { %235 = sbr.rel (%p232_p3) target bundleno = 630 (0x276), region = 40  ;;  %1213 = vset.pattern.permute.xlu1 (!%p232_p3), %v1251_v0  ;;  %1212 = vset.pattern.permute.xlu0 (!%p232_p3), %v1251_v0  ;;  %p272_p4 = scmp.lt.s32.totalorder (!%p232_p3), %s1015_s22, 31  ;;  %v1217_v10 = vld [vmem:[%s1455_s4] sm:$0xff] (!%p232_p3)   ;;  %v1219_v12 = vld [vmem:[%s1451_s0 + $0x18] sm:$0xff] (!%p232_p3)   ;;  %vm649_vm5 = vcmask (!%p232_p3), 523264   ;;  %v1252_v36 = vmov (!%p232_p3), 0.0  }
   0x8   : > { %1137 = vmatprep.subr.bf16.mxu1 (!%p232_p3), %v1214_v1  ;;  %1119 = vmatprep.subr.bf16.mxu0 (!%p232_p3), %v1217_v10  ;;  %v1363_v31 = vand.u32 (!%p232_p3), 127, %v495_v30  ;;  %p287_p5 = scmp.lt.s32.totalorder (!%p232_p3), %s1241_s18, 1 }
   0x9   : > { %1138 = vmatpush3.bf16.msra.mxu1 (!%p232_p3), %v1214_v1  ;;  %1120 = vmatpush3.bf16.msra.mxu0 (!%p232_p3), %v1217_v10 }
   0xa   : > { %1139 = vmatprep.subr.bf16.mxu1 (!%p232_p3), %v1215_v2 }
   0xd   : > { %1140 = vmatpush3.bf16.msra.mxu1 (!%p232_p3), %v1215_v2 }
   0xe   : > { %s1468_s22 = smov (!%p272_p4, %s1015_s22), 31  ;;  %1141 = vmatprep.subr.bf16.mxu1 %v1216_v9  ;;  %s1470_s18 = smov (!%p287_p5, %s1241_s18), 1 }
   0xf   : > { %s1018_s27 = sshll.u32 %s1468_s22, 3  ;;  %s1016_s6 = sshll.u32 %s1468_s22, 2 }
  0x10   : > { %s1314_s30 = scalar_lea.vmem %s1453_s2, %s1018_s27  ;;  %s1323_s9 = scalar_lea.vmem %s1452_s1, %s1016_s6 }
  0x11   : > { %v499_v3 = vld [vmem:[%s1314_s30 + $0x10] sm:$0xff]  ;;  %v497_v4 = vld [vmem:[%s1314_s30] sm:$0xff]  ;;  %v500_v5 = vld [vmem:[%s1314_s30 + $0x18] sm:$0xff]  ;;  %1142 = vmatpush3.bf16.msra.mxu1 %v1216_v9  ;;  %s289_s22 = scalar_lea.vmem %s1454_s3, %s1470_s18  ;;  %s1085_s23 = sshll.u32 %s1470_s18, 6 }
  0x12   : > { %520 = vperm.xlu1 %1213, %v499_v3   ;;  %514 = vperm.xlu0 %1212, %v497_v4   ;;  %v498_v6 = vld [vmem:[%s1314_s30 + $0x8] sm:$0xff]  ;;  %v501_v8 = vld [vmem:[%s1314_s30 + $0x20] sm:$0xff]  ;;  %v504_v13 = vld [vmem:[%s1314_s30 + $0x38] sm:$0xff]  ;;  %s295_s26 = scalar_lea.vmem %s1456_s5, %s1085_s23 }
  0x13   : > { %v502_v7 = vld [vmem:[%s1314_s30 + $0x28] sm:$0xff]  ;;  %v1218_v11 = vld [vmem:[%s1323_s9] sm:$0xff]   ;;  %v503_v14 = vld [vmem:[%s1314_s30 + $0x30] sm:$0xff]  ;;  %1143 = vmatprep.subr.bf16.mxu1 %v1219_v12 }
  0x14   : > { %v1220_v15 = vld [vmem:[%s1323_s9 + $0x8] sm:$0xff]   ;;  %1121 = vmatprep.mubr.msk.bf16.mxu0 %vm373_vm0, %v1218_v11  ;;  %v1221_v16 = vld [vmem:[%s1323_s9 + $0x10] sm:$0xff]   ;;  %v505_v18 = vld [vmem:[%s1314_s30 + $0x40] sm:$0xff] }
  0x15   : > { %1122 = vmatmul.mubr.msk.bf16.vlgmr.msra.gmra.mrb[0].mxu0 %vm373_vm0, %v1220_v15  ;;  %1144 = vmatpush3.bf16.msra.mxu1 %v1219_v12  ;;  %v506_v17 = vld [vmem:[%s1314_s30 + $0x48] sm:$0xff]  ;;  %v1222_v19 = vld [vmem:[%s1323_s9 + $0x18] sm:$0xff]   ;;  %v507_v21 = vld [vmem:[%s1314_s30 + $0x50] sm:$0xff] }
  0x16   : > { %523 = vperm.xlu1 %1213, %v500_v5   ;;  %517 = vperm.xlu0 %1212, %v498_v6   ;;  %v508_v20 = vld [vmem:[%s1314_s30 + $0x58] sm:$0xff]  ;;  %v1223_v22 = vld [vmem:[%s1323_s9 + $0x20] sm:$0xff]   ;;  %v510_v23 = vld [vmem:[%s1314_s30 + $0x68] sm:$0xff] }
  0x17   : > { %1125 = vmatprep.mubr.msk.bf16.mxu0 %vm373_vm0, %v1221_v16  ;;  %v509_v24 = vld [vmem:[%s1314_s30 + $0x60] sm:$0xff]  ;;  %v1224_v25 = vld [vmem:[%s1323_s9 + $0x28] sm:$0xff]   ;;  %v512_v26 = vld [vmem:[%s1314_s30 + $0x78] sm:$0xff] }
  0x18   : > { %v511_v27 = vld [vmem:[%s1314_s30 + $0x70] sm:$0xff]  ;;  %v1226_v29 = vld [vmem:[%s1323_s9 + $0x38] sm:$0xff]  }
  0x19   : > { %v1225_v28 = vld [vmem:[%s1323_s9 + $0x30] sm:$0xff]  }
  0x1a   : > { %529 = vperm.xlu1 %1213, %v502_v7   ;;  %526 = vperm.xlu0 %1212, %v501_v8  }
  0x1d   : > { %1126 = vmatmul.mubr.msk.bf16.gmra.mrb[4].mxu0 %vm373_vm0, %v1222_v19 }
  0x1e   : > { %535 = vperm.xlu1 %1213, %v504_v13   ;;  %532 = vperm.xlu0 %1212, %v503_v14  }
  0x1f   : > { %1129 = vmatprep.mubr.msk.bf16.mxu0 %vm373_vm0, %v1223_v22 }
  0x22   : > { %541 = vperm.xlu1 %1213, %v506_v17   ;;  %538 = vperm.xlu0 %1212, %v505_v18  }
  0x25   : > { %1130 = vmatmul.mubr.msk.bf16.gmra.mrb[8].mxu0 %vm373_vm0, %v1224_v25  ;;  %v788_v25 = vshrl.u32 %v495_v30, 7 }
  0x26   : > { %547 = vperm.xlu1 %1213, %v508_v20   ;;  %544 = vperm.xlu0 %1212, %v507_v21  }
  0x27   : > { %1133 = vmatprep.mubr.msk.bf16.mxu0 %vm373_vm0, %v1225_v28  ;;  %v790_v28 = vadd.s32 16, %v788_v25  ;;  %v792_v30 = vadd.s32 32, %v788_v25 }
  0x2a   : > { %553 = vperm.xlu1 %1213, %v510_v23   ;;  %550 = vperm.xlu0 %1212, %v509_v24  }
  0x2d   : > { %1134 = vmatmul.mubr.msk.bf16.gmra.mrb[12].mxu0 %vm373_vm0, %v1226_v29  ;;  %v791_v29 = vadd.s32 24, %v788_v25 }
  0x2e   : > { %559 = vperm.xlu1 %1213, %v512_v26   ;;  %556 = vperm.xlu0 %1212, %v511_v27   ;;  %v789_v26 = vadd.s32 8, %v788_v25  ;;  %v1066_v27 = vld [vmem:[%s289_s22] ss:$0 sm:$0xff] }
  0x91   : > { %v521_v32 = vpop.permute.xlu1 %520  ;;  %v515_v33 = vpop.permute.xlu0 %514 }
  0x92   : > { %vm563_vm1 = vcmp.eq.s32.totalorder %v521_v32, %v1363_v31  ;;  %vm561_vm2 = vcmp.eq.s32.totalorder %v515_v33, %v1363_v31  ;;  %v793_v33 = vadd.s32 40, %v788_v25 }
  0x93   : > { %v1040_v37 = vsel %vm563_vm1, 1.0, %v1252_v36  ;;  %v1038_v38 = vsel %vm561_vm2, 1.0, %v1252_v36  ;;  %vm801_vm2 = vcmp.eq.s32.totalorder %v788_v25, %v1066_v27 }
  0x95   : > { %v524_v34 = vpop.permute.xlu1 %523  ;;  %v518_v35 = vpop.permute.xlu0 %517 }
  0x96   : > { %vm564_vm3 = vcmp.eq.s32.totalorder %v524_v34, %v1363_v31  ;;  %vm562_vm4 = vcmp.eq.s32.totalorder %v518_v35, %v1363_v31  ;;  %v794_v34 = vadd.s32 48, %v788_v25  ;;  %v795_v35 = vadd.s32 56, %v788_v25 }
  0x97   : > { %v1041_v39 = vsel %vm564_vm3, 1.0, %v1252_v36  ;;  %v1039_v40 = vsel %vm562_vm4, 1.0, %v1252_v36  ;;  %vm802_vm3 = vcmp.eq.s32.totalorder %v789_v26, %v1066_v27 }
  0x98   : > { %v610_v41 = vpack.c.bf16 %v1041_v39, %v1040_v37  ;;  %v609_v42 = vpack.c.bf16 %v1039_v40, %v1038_v38  ;;  %vm1075_vm4 = vmpackc.low %vm802_vm3, %vm801_vm2 }
  0x99   : > { %v530_v43 = vpop.permute.xlu1 %529  ;;  %v527_v44 = vpop.permute.xlu0 %526 }
  0x9a   : > { %vm566_vm6 = vcmp.eq.s32.totalorder %v530_v43, %v1363_v31  ;;  %vm565_vm7 = vcmp.eq.s32.totalorder %v527_v44, %v1363_v31  ;;  %1145 = vmatprep.mubr.msk.bf16.mxu1 %vm649_vm5, %v609_v42 }
  0x9b   : > { %v1043_v45 = vsel %vm566_vm6, 1.0, %v1252_v36  ;;  %v1042_v46 = vsel %vm565_vm7, 1.0, %v1252_v36  ;;  %1146 = vmatmul.mubr.msk.bf16.vlgmr.msra.gmra.mrb[0].mxu1 %vm649_vm5, %v610_v41  ;;  %vm804_vm6 = vcmp.eq.s32.totalorder %v791_v29, %v1066_v27 }
  0x9c   : > { %v611_v47 = vpack.c.bf16 %v1043_v45, %v1042_v46 }
  0x9d   : > { %v536_v48 = vpop.permute.xlu1 %535  ;;  %v533_v49 = vpop.permute.xlu0 %532 }
  0x9e   : > { %vm568_vm8 = vcmp.eq.s32.totalorder %v536_v48, %v1363_v31  ;;  %vm567_vm9 = vcmp.eq.s32.totalorder %v533_v49, %v1363_v31  ;;  %1149 = vmatprep.mubr.msk.bf16.mxu1 %vm649_vm5, %v611_v47 }
  0x9f   : > { %v1045_v50 = vsel %vm568_vm8, 1.0, %v1252_v36  ;;  %v1044_v51 = vsel %vm567_vm9, 1.0, %v1252_v36  ;;  %vm805_vm8 = vcmp.eq.s32.totalorder %v792_v30, %v1066_v27  ;;  %vm806_vm9 = vcmp.eq.s32.totalorder %v793_v33, %v1066_v27 }
  0xa0   : > { %v612_v52 = vpack.c.bf16 %v1045_v50, %v1044_v51 }
  0xa1   : > { %v542_v53 = vpop.permute.xlu1 %541  ;;  %v539_v54 = vpop.permute.xlu0 %538 }
  0xa2   : > { %vm570_vm10 = vcmp.eq.s32.totalorder %v542_v53, %v1363_v31  ;;  %vm569_vm11 = vcmp.eq.s32.totalorder %v539_v54, %v1363_v31 }
  0xa3   : > { %v1047_v55 = vsel %vm570_vm10, 1.0, %v1252_v36  ;;  %v1046_v56 = vsel %vm569_vm11, 1.0, %v1252_v36  ;;  %1150 = vmatmul.mubr.msk.bf16.gmra.mrb[4].mxu1 %vm649_vm5, %v612_v52  ;;  %vm1415_vm10 = vmpackc.low %vm806_vm9, %vm805_vm8  ;;  %vm807_vm11 = vcmp.eq.s32.totalorder %v794_v34, %v1066_v27 }
  0xa4   : > { %v613_v57 = vpack.c.bf16 %v1047_v55, %v1046_v56 }
  0xa5   : > { %v548_v58 = vpop.permute.xlu1 %547  ;;  %v545_v59 = vpop.permute.xlu0 %544 }
  0xa6   : > { %vm572_vm12 = vcmp.eq.s32.totalorder %v548_v58, %v1363_v31  ;;  %vm571_vm13 = vcmp.eq.s32.totalorder %v545_v59, %v1363_v31  ;;  %1153 = vmatprep.mubr.msk.bf16.mxu1 %vm649_vm5, %v613_v57 }
  0xa7   : > { %v1049_v60 = vsel %vm572_vm12, 1.0, %v1252_v36  ;;  %v1048_v61 = vsel %vm571_vm13, 1.0, %v1252_v36  ;;  %vm808_vm12 = vcmp.eq.s32.totalorder %v795_v35, %v1066_v27 }
  0xa8   : > { %v614_v62 = vpack.c.bf16 %v1049_v60, %v1048_v61  ;;  %vm1419_vm13 = vmpackc.low %vm808_vm12, %vm807_vm11 }
  0xa9   : > { %v554_v63 = vpop.permute.xlu1 %553  ;;  %v551_v0 = vpop.permute.xlu0 %550 }
  0xaa   : > { %vm574_vm14 = vcmp.eq.s32.totalorder %v554_v63, %v1363_v31  ;;  %vm573_vm15 = vcmp.eq.s32.totalorder %v551_v0, %v1363_v31 }
  0xab   : > { %v1051_v1 = vsel %vm574_vm14, 1.0, %v1252_v36  ;;  %v1050_v2 = vsel %vm573_vm15, 1.0, %v1252_v36  ;;  %1154 = vmatmul.mubr.msk.bf16.gmra.mrb[8].mxu1 %vm649_vm5, %v614_v62 }
  0xac   : > { %v615_v3 = vpack.c.bf16 %v1051_v1, %v1050_v2 }
  0xad   : > { %v560_v4 = vpop.permute.xlu1 %559  ;;  %v557_v5 = vpop.permute.xlu0 %556 }
  0xae   : > { %vm576_vm0 = vcmp.eq.s32.totalorder %v560_v4, %v1363_v31  ;;  %vm575_vm1 = vcmp.eq.s32.totalorder %v557_v5, %v1363_v31  ;;  %1157 = vmatprep.mubr.msk.bf16.mxu1 %vm649_vm5, %v615_v3  ;;  %v1253_v31 = vmov 1.0|1.0  }
  0xaf   : > { %v1053_v6 = vsel %vm576_vm0, 1.0, %v1252_v36  ;;  %v1052_v7 = vsel %vm575_vm1, 1.0, %v1252_v36  ;;  %1177 = vmatprep.mubr.msk.bf16.mxu0 %vm1075_vm4, %v1253_v31 }
  0xb0   : > { %v616_v8 = vpack.c.bf16 %v1053_v6, %v1052_v7 }
  0xb3   : > { %1158 = vmatmul.mubr.msk.bf16.gmra.mrb[12].mxu1 %vm649_vm5, %v616_v8  ;;  %vm803_vm5 = vcmp.eq.s32.totalorder %v790_v28, %v1066_v27 }
  0xb4   : > { %vm1411_vm7 = vmpackc.low %vm804_vm6, %vm803_vm5 }
  0xe8   : > { %v1123_v9 = vpop.f32.mrb[0].mxu0 }
  0xe9   : > { %v432_v10 = vpop.f32.mrb[1].mxu0 }
  0xea   : > { %v1124_v11 = vpop.f32.mrb[2].mxu0 }
  0xeb   : > { %v435_v12 = vpop.f32.mrb[3].mxu0 }
  0xf0   : > { %v1127_v13 = vpop.f32.mrb[4].mxu0 }
  0xf1   : > { %v448_v14 = vpop.f32.mrb[5].mxu0 }
  0xf2   : > { %v1128_v15 = vpop.f32.mrb[6].mxu0 }
  0xf3   : > { %v451_v16 = vpop.f32.mrb[7].mxu0 }
  0xf8   : > { %v1131_v17 = vpop.f32.mrb[8].mxu0 }
  0xf9   : > { %v464_v18 = vpop.f32.mrb[9].mxu0 }
  0xfa   : > { %v1389_v19 = vpop.f32.mrb[10].mxu0 }
  0xfb   : > { %v1391_v20 = vpop.f32.mrb[11].mxu0 }
 0x100   : > { %v1393_v21 = vpop.f32.mrb[12].mxu0 }
 0x101   : > { %v1395_v22 = vpop.f32.mrb[13].mxu0 }
 0x102   : > { %v1397_v23 = vpop.f32.mrb[14].mxu0 }
 0x103   : > { %v1399_v24 = vpop.f32.mrb[15].mxu0 }
 0x16e   : > { %v1147_v38 = vpop.f32.mrb[0].mxu1 }
 0x16f   : > { %v773_v39 = vmul.f32 %v1147_v38, %v1123_v9  ;;  %v708_v40 = vpop.f32.mrb[1].mxu1 }
 0x170   : > { %v771_v41 = vmul.f32 %v708_v40, %v432_v10  ;;  %v1148_v42 = vpop.f32.mrb[2].mxu1 }
 0x171   : > { %v774_v43 = vmul.f32 %v1148_v42, %v1124_v11  ;;  %v711_v44 = vpop.f32.mrb[3].mxu1 }
 0x172   : > { %v772_v45 = vmul.f32 %v711_v44, %v435_v12 }
 0x173   : > { %v830_v46 = vpack.c.bf16 %v774_v43, %v773_v39 }
 0x174   : > { %v829_v47 = vpack.c.bf16 %v772_v45, %v771_v41 }
 0x176   : > { %v1151_v48 = vpop.f32.mrb[4].mxu1  ;;  %1161 = vmatprep.subr.bf16.mxu0 %v829_v47 }
 0x177   : > { %v777_v49 = vmul.f32 %v1151_v48, %v1127_v13  ;;  %v724_v50 = vpop.f32.mrb[5].mxu1  ;;  %1162 = vmatpush3.bf16.msra.mxu0 %v829_v47 }
 0x178   : > { %v775_v51 = vmul.f32 %v724_v50, %v448_v14  ;;  %v1152_v52 = vpop.f32.mrb[6].mxu1  ;;  %1163 = vmatprep.subr.bf16.mxu0 %v830_v46 }
 0x179   : > { %v778_v53 = vmul.f32 %v1152_v52, %v1128_v15  ;;  %v727_v54 = vpop.f32.mrb[7].mxu1 }
 0x17a   : > { %v776_v55 = vmul.f32 %v727_v54, %v451_v16 }
 0x17b   : > { %v832_v56 = vpack.c.bf16 %v778_v53, %v777_v49  ;;  %1164 = vmatpush3.bf16.msra.mxu0 %v830_v46 }
 0x17c   : > { %v831_v57 = vpack.c.bf16 %v776_v55, %v775_v51 }
 0x17e   : > { %v1155_v58 = vpop.f32.mrb[8].mxu1  ;;  %1165 = vmatprep.subr.bf16.mxu0 %v831_v57 }
 0x17f   : > { %v781_v59 = vmul.f32 %v1155_v58, %v1131_v17  ;;  %v740_v60 = vpop.f32.mrb[9].mxu1  ;;  %1166 = vmatpush3.bf16.msra.mxu0 %v831_v57 }
 0x180   : > { %v779_v61 = vmul.f32 %v740_v60, %v464_v18  ;;  %v1156_v62 = vpop.f32.mrb[10].mxu1  ;;  %1167 = vmatprep.subr.bf16.mxu0 %v832_v56 }
 0x181   : > { %v782_v63 = vmul.f32 %v1156_v62, %v1389_v19  ;;  %v743_v0 = vpop.f32.mrb[11].mxu1 }
 0x182   : > { %v780_v1 = vmul.f32 %v743_v0, %v1391_v20 }
 0x183   : > { %v834_v2 = vpack.c.bf16 %v782_v63, %v781_v59  ;;  %1168 = vmatpush3.bf16.msra.mxu0 %v832_v56 }
 0x184   : > { %v833_v3 = vpack.c.bf16 %v780_v1, %v779_v61 }
 0x186   : > { %v1159_v4 = vpop.f32.mrb[12].mxu1  ;;  %1169 = vmatprep.subr.bf16.mxu0 %v833_v3 }
 0x187   : > { %v785_v5 = vmul.f32 %v1159_v4, %v1393_v21  ;;  %v756_v6 = vpop.f32.mrb[13].mxu1  ;;  %1170 = vmatpush3.bf16.msra.mxu0 %v833_v3 }
 0x188   : > { %v783_v7 = vmul.f32 %v756_v6, %v1395_v22  ;;  %v1160_v8 = vpop.f32.mrb[14].mxu1  ;;  %1171 = vmatprep.subr.bf16.mxu0 %v834_v2 }
 0x189   : > { %v786_v9 = vmul.f32 %v1160_v8, %v1397_v23  ;;  %v759_v10 = vpop.f32.mrb[15].mxu1 }
 0x18a   : > { %v784_v11 = vmul.f32 %v759_v10, %v1399_v24 }
 0x18b   : > { %v836_v12 = vpack.c.bf16 %v786_v9, %v785_v5  ;;  %1172 = vmatpush3.bf16.msra.mxu0 %v834_v2 }
 0x18c   : > { %v835_v13 = vpack.c.bf16 %v784_v11, %v783_v7 }
 0x18e   : > { %1173 = vmatprep.subr.bf16.mxu0 %v835_v13 }
 0x18f   : > { %1174 = vmatpush3.bf16.msra.mxu0 %v835_v13 }
 0x190   : > { %1175 = vmatprep.subr.bf16.mxu0 %v836_v12 }
 0x193   : > { %1176 = vmatpush3.bf16.msra.mxu0 %v836_v12 }
 0x196   : > { %1178 = vmatmul.mubr.msk.bf16.vlgmr.msra.gmra.mrb[16].mxu0 %vm1411_vm7, %v1253_v31 }
 0x197   : > { %1181 = vmatprep.mubr.msk.bf16.mxu0 %vm1415_vm10, %v1253_v31 }
 0x19e   : > { %1182 = vmatmul.mubr.msk.bf16.gmra.mrb[20].mxu0 %vm1419_vm13, %v1253_v31 }
 0x269   : > { %v1179_v14 = vpop.f32.mrb[16].mxu0 }
 0x26a   : > { %v871_v15 = vpop.f32.mrb[17].mxu0  ;;  %920 = vst [vmem:[%s295_s26 + $0x10] sm:$0xff] %v1179_v14 }
 0x26b   : > { %v1180_v16 = vpop.f32.mrb[18].mxu0  ;;  %918 = vst [vmem:[%s295_s26] sm:$0xff] %v871_v15 }
 0x26c   : > { %v874_v17 = vpop.f32.mrb[19].mxu0  ;;  %921 = vst [vmem:[%s295_s26 + $0x18] sm:$0xff] %v1180_v16 }
 0x26d   : > { %919 = vst [vmem:[%s295_s26 + $0x8] sm:$0xff] %v874_v17 }
 0x271   : > { %v1183_v18 = vpop.f32.mrb[20].mxu0 }
 0x272   : > { %v887_v19 = vpop.f32.mrb[21].mxu0  ;;  %924 = vst [vmem:[%s295_s26 + $0x30] sm:$0xff] %v1183_v18 }
 0x273   : > { %v1184_v20 = vpop.f32.mrb[22].mxu0  ;;  %922 = vst [vmem:[%s295_s26 + $0x20] sm:$0xff] %v887_v19 }
 0x274   : > { %v890_v21 = vpop.f32.mrb[23].mxu0  ;;  %925 = vst [vmem:[%s295_s26 + $0x38] sm:$0xff] %v1184_v20 }
 0x275   : > { %923 = vst [vmem:[%s295_s26 + $0x28] sm:$0xff] %v890_v21 }
 0x276 PF: > { %s15_s20 = sadd.s32 1, %s1249_s20   ;;  %s1463_s18 = smov %s1245_s19 }
 0x277   : > { %p12_p6 = scmp.ge.s32.totalorder %s15_s20, 4   ;;  %s1464_s19 = smov %s1466_s21 }
 0x279   :  { %14 = sbr.rel (!%p12_p6) target bundleno = 2 (0x2), region = 80 }

// kernel: hadamard_block_fwd.5
= control target key start
LH: loop header
LB: loop body
LE: loop exit
PB: predicated region body
PF: predicated region fallthrough
CT: control target
= control target key end

     0   :  { %s1757_s1 = inlined_call_operand.vmem [shape: bf16[5,128,128], index: 1, kind: input, shape index: {}]   ;;  %s1758_s0 = inlined_call_operand.vmem [shape: f32[2,64,128], index: 0, kind: input, shape index: {}]   ;;  %s1759_s2 = inlined_call_operand.vmem [shape: f32[64,128], index: 2, kind: output, shape index: {}]  }
   0x1   :  { %v1282_v0 = vld [vmem:[%s1757_s1] sm:$0xff]   ;;  %v1283_v1 = vld [vmem:[%s1757_s1 + $0x8] sm:$0xff]   ;;  %v1284_v2 = vld [vmem:[%s1757_s1 + $0x10] sm:$0xff]  }
   0x2   :  { %1146 = vmatprep.subr.bf16.mxu0 %v1282_v0  ;;  %v1285_v3 = vld [vmem:[%s1757_s1 + $0x18] sm:$0xff]   ;;  %v12_v4 = vld [vmem:[%s1758_s0] sm:$0xff]  ;;  %v13_v5 = vld [vmem:[%s1758_s0 + $0x8] sm:$0xff] }
   0x3   :  { %1147 = vmatpush3.bf16.msra.mxu0 %v1282_v0  ;;  %v974_v6 = vld [vmem:[%s1758_s0 + $0x40] sm:$0xff]  ;;  %v975_v7 = vld [vmem:[%s1758_s0 + $0x48] sm:$0xff]  ;;  %v1288_v13 = vld [vmem:[%s1757_s1 + $0x30] sm:$0xff]  }
   0x4   :  { %1148 = vmatprep.subr.bf16.mxu0 %v1283_v1  ;;  %v29_v8 = vadd.f32 %v974_v6, %v12_v4  ;;  %v30_v9 = vadd.f32 %v975_v7, %v13_v5  ;;  %v1286_v10 = vld [vmem:[%s1757_s1 + $0x20] sm:$0xff]   ;;  %v1287_v12 = vld [vmem:[%s1757_s1 + $0x28] sm:$0xff]   ;;  %v14_v14 = vld [vmem:[%s1758_s0 + $0x10] sm:$0xff] }
   0x5   :  { %v15_v15 = vld [vmem:[%s1758_s0 + $0x18] sm:$0xff]  ;;  %v976_v16 = vld [vmem:[%s1758_s0 + $0x50] sm:$0xff]  ;;  %v16_v19 = vld [vmem:[%s1758_s0 + $0x20] sm:$0xff] }
   0x6   :  { %v37_v11 = vpack.c.bf16 %v30_v9, %v29_v8  ;;  %v977_v17 = vld [vmem:[%s1758_s0 + $0x58] sm:$0xff]  ;;  %v17_v20 = vld [vmem:[%s1758_s0 + $0x28] sm:$0xff]  ;;  %v978_v21 = vld [vmem:[%s1758_s0 + $0x60] sm:$0xff]  ;;  %v31_v23 = vadd.f32 %v976_v16, %v14_v14 }
   0x7   :  { %1149 = vmatpush3.bf16.msra.mxu0 %v1283_v1  ;;  %v1289_v18 = vld [vmem:[%s1757_s1 + $0x38] sm:$0xff]   ;;  %v979_v22 = vld [vmem:[%s1758_s0 + $0x68] sm:$0xff]  ;;  %v32_v24 = vadd.f32 %v977_v17, %v15_v15  ;;  %v33_v25 = vadd.f32 %v978_v21, %v16_v19  ;;  %v18_v27 = vld [vmem:[%s1758_s0 + $0x30] sm:$0xff] }
   0x8   :  { %1150 = vmatprep.subr.bf16.mxu0 %v1284_v2  ;;  %1162 = vmatprep.mubr.bf16.mxu0 %v37_v11  ;;  %v34_v26 = vadd.f32 %v979_v22, %v17_v20  ;;  %v19_v28 = vld [vmem:[%s1758_s0 + $0x38] sm:$0xff]  ;;  %v980_v29 = vld [vmem:[%s1758_s0 + $0x70] sm:$0xff]  ;;  %v1290_v36 = vld [vmem:[%s1757_s1 + $0x40] sm:$0xff]  }
   0x9   :  { %v981_v30 = vld [vmem:[%s1758_s0 + $0x78] sm:$0xff]  ;;  %v38_v31 = vpack.c.bf16 %v32_v24, %v31_v23  ;;  %v35_v33 = vadd.f32 %v980_v29, %v18_v27  ;;  %1170 = vmatprep.subr.bf16.mxu1 %v1290_v36  ;;  %v1291_v37 = vld [vmem:[%s1757_s1 + $0x48] sm:$0xff]   ;;  %v1292_v38 = vld [vmem:[%s1757_s1 + $0x50] sm:$0xff]  }
   0xa   :  { %v39_v32 = vpack.c.bf16 %v34_v26, %v33_v25  ;;  %v36_v34 = vadd.f32 %v981_v30, %v19_v28  ;;  %1171 = vmatpush3.bf16.msra.mxu1 %v1290_v36  ;;  %v1293_v39 = vld [vmem:[%s1757_s1 + $0x58] sm:$0xff]   ;;  %v1294_v40 = vld [vmem:[%s1757_s1 + $0x60] sm:$0xff]   ;;  %v1295_v41 = vld [vmem:[%s1757_s1 + $0x68] sm:$0xff]  }
   0xb   :  { %1151 = vmatpush3.bf16.msra.mxu0 %v1284_v2  ;;  %1172 = vmatprep.subr.bf16.mxu1 %v1291_v37  ;;  %v1296_v42 = vld [vmem:[%s1757_s1 + $0x70] sm:$0xff]   ;;  %v1297_v43 = vld [vmem:[%s1757_s1 + $0x78] sm:$0xff]  }
   0xc   :  { %1152 = vmatprep.subr.bf16.mxu0 %v1285_v3  ;;  %v40_v35 = vpack.c.bf16 %v36_v34, %v35_v33 }
   0xe   :  { %1173 = vmatpush3.bf16.msra.mxu1 %v1291_v37 }
   0xf   :  { %1153 = vmatpush3.bf16.msra.mxu0 %v1285_v3  ;;  %1174 = vmatprep.subr.bf16.mxu1 %v1292_v38 }
  0x10   :  { %1154 = vmatprep.subr.bf16.mxu0 %v1286_v10 }
  0x12   :  { %1175 = vmatpush3.bf16.msra.mxu1 %v1292_v38 }
  0x13   :  { %1155 = vmatpush3.bf16.msra.mxu0 %v1286_v10  ;;  %1176 = vmatprep.subr.bf16.mxu1 %v1293_v39 }
  0x14   :  { %1156 = vmatprep.subr.bf16.mxu0 %v1287_v12 }
  0x16   :  { %1177 = vmatpush3.bf16.msra.mxu1 %v1293_v39 }
  0x17   :  { %1157 = vmatpush3.bf16.msra.mxu0 %v1287_v12  ;;  %1178 = vmatprep.subr.bf16.mxu1 %v1294_v40 }
  0x18   :  { %1158 = vmatprep.subr.bf16.mxu0 %v1288_v13 }
  0x1a   :  { %1179 = vmatpush3.bf16.msra.mxu1 %v1294_v40  ;;  %v1298_v40 = vld [vmem:[%s1757_s1 + $0x80] sm:$0xff]  }
  0x1b   :  { %1159 = vmatpush3.bf16.msra.mxu0 %v1288_v13  ;;  %1180 = vmatprep.subr.bf16.mxu1 %v1295_v41 }
  0x1c   :  { %1160 = vmatprep.subr.bf16.mxu0 %v1289_v18 }
  0x1e   :  { %1181 = vmatpush3.bf16.msra.mxu1 %v1295_v41  ;;  %v1299_v41 = vld [vmem:[%s1757_s1 + $0x88] sm:$0xff]  }
  0x1f   :  { %1161 = vmatpush3.bf16.msra.mxu0 %v1289_v18  ;;  %1182 = vmatprep.subr.bf16.mxu1 %v1296_v42 }
  0x20   :  { %1194 = vmatprep.subr.bf16.mxu0 %v1298_v40 }
  0x22   :  { %1163 = vmatmul.mubr.bf16.vlgmr.msra.gmra.mrb[0].mxu0 %v38_v31  ;;  %1183 = vmatpush3.bf16.msra.mxu1 %v1296_v42  ;;  %v1300_v42 = vld [vmem:[%s1757_s1 + $0x90] sm:$0xff]  }
  0x23   :  { %1166 = vmatprep.mubr.bf16.mxu0 %v39_v32  ;;  %1184 = vmatprep.subr.bf16.mxu1 %v1297_v43 }
  0x24   :  { %1195 = vmatpush3.bf16.msra.mxu0 %v1298_v40 }
  0x25   :  { %1196 = vmatprep.subr.bf16.mxu0 %v1299_v41 }
  0x26   :  { %1185 = vmatpush3.bf16.msra.mxu1 %v1297_v43  ;;  %v1301_v43 = vld [vmem:[%s1757_s1 + $0x98] sm:$0xff]  }
  0x28   :  { %1197 = vmatpush3.bf16.msra.mxu0 %v1299_v41 }
  0x29   :  { %1198 = vmatprep.subr.bf16.mxu0 %v1300_v42 }
  0x2a   :  { %1167 = vmatmul.mubr.bf16.gmra.mrb[4].mxu0 %v40_v35 }
  0x2c   :  { %1199 = vmatpush3.bf16.msra.mxu0 %v1300_v42 }
  0x2d   :  { %1200 = vmatprep.subr.bf16.mxu0 %v1301_v43 }
  0x30   :  { %1201 = vmatpush3.bf16.msra.mxu0 %v1301_v43 }
  0xf5   :  { %v1593_v44 = vpop.f32.mrb[0].mxu0 }
  0xf6   :  { %v172_v45 = vsub.f32 0.0, %v1593_v44  ;;  %v139_v46 = vpop.f32.mrb[1].mxu0 }
  0xf7   :  { %v170_v47 = vsub.f32 0.0, %v139_v46  ;;  %v1165_v48 = vpop.f32.mrb[2].mxu0 }
  0xf8   :  { %v182_v49 = vmul.f32 1.442695, %v172_v45  ;;  %v173_v50 = vsub.f32 0.0, %v1165_v48  ;;  %v142_v51 = vpop.f32.mrb[3].mxu0  ;;  %v1303_v45 = vld [vmem:[%s1757_s1 + $0xa8] sm:$0xff]  }
  0xf9   :  { %v178_v52 = vmul.f32 1.442695, %v170_v47  ;;  %v171_v53 = vsub.f32 0.0, %v142_v51  ;;  %v1305_v47 = vld [vmem:[%s1757_s1 + $0xb8] sm:$0xff]  }
  0xfa   :  { %1322 = vpow2.f32 %v182_v49  ;;  %v184_v54 = vmul.f32 1.442695, %v173_v50 }
  0xfb   :  { %1324 = vpow2.f32 %v178_v52  ;;  %v180_v55 = vmul.f32 1.442695, %v171_v53 }
  0xfc   :  { %1326 = vpow2.f32 %v184_v54 }
  0xfd   :  { %1328 = vpow2.f32 %v180_v55  ;;  %v1168_v56 = vpop.f32.mrb[4].mxu0 }
  0xfe   :  { %v176_v57 = vsub.f32 0.0, %v1168_v56  ;;  %v155_v58 = vpop.f32.mrb[5].mxu0 }
  0xff   :  { %v174_v59 = vsub.f32 0.0, %v155_v58  ;;  %v1169_v60 = vpop.f32.mrb[6].mxu0 }
 0x100   :  { %v190_v61 = vmul.f32 1.442695, %v176_v57  ;;  %v177_v62 = vsub.f32 0.0, %v1169_v60  ;;  %v158_v63 = vpop.f32.mrb[7].mxu0 }
 0x101   :  { %v186_v0 = vmul.f32 1.442695, %v174_v59  ;;  %v175_v1 = vsub.f32 0.0, %v158_v63 }
 0x102   :  { %1330 = vpow2.f32 %v190_v61  ;;  %v192_v2 = vmul.f32 1.442695, %v177_v62 }
 0x103   :  { %1332 = vpow2.f32 %v186_v0  ;;  %v188_v3 = vmul.f32 1.442695, %v175_v1 }
 0x104   :  { %v1323_v4 = vpop.eup %1322  ;;  %1334 = vpow2.f32 %v192_v2 }
 0x105   :  { %v1325_v5 = vpop.eup %1324  ;;  %v196_v6 = vadd.f32 1.0, %v1323_v4  ;;  %1336 = vpow2.f32 %v188_v3 }
 0x106   :  { %v1327_v7 = vpop.eup %1326  ;;  %v194_v8 = vadd.f32 1.0, %v1325_v5 }
 0x107   :  { %v1329_v9 = vpop.eup %1328  ;;  %1338 = vrcp.f32 %v196_v6  ;;  %v197_v10 = vadd.f32 1.0, %v1327_v7 }
 0x108   :  { %1340 = vrcp.f32 %v194_v8  ;;  %v195_v11 = vadd.f32 1.0, %v1329_v9 }
 0x109   :  { %1342 = vrcp.f32 %v197_v10 }
 0x10a   :  { %1344 = vrcp.f32 %v195_v11 }
 0x10c   :  { %v1331_v12 = vpop.eup %1330 }
 0x10d   :  { %v1333_v13 = vpop.eup %1332  ;;  %v200_v14 = vadd.f32 1.0, %v1331_v12 }
 0x10e   :  { %v1335_v15 = vpop.eup %1334  ;;  %v198_v16 = vadd.f32 1.0, %v1333_v13 }
 0x10f   :  { %v1337_v17 = vpop.eup %1336  ;;  %1346 = vrcp.f32 %v200_v14  ;;  %v201_v18 = vadd.f32 1.0, %v1335_v15 }
 0x110   :  { %1348 = vrcp.f32 %v198_v16  ;;  %v199_v19 = vadd.f32 1.0, %v1337_v17 }
 0x111   :  { %v1339_v20 = vpop.eup %1338  ;;  %1350 = vrcp.f32 %v201_v18 }
 0x112   :  { %v1341_v21 = vpop.eup %1340  ;;  %1352 = vrcp.f32 %v199_v19  ;;  %v1603_v27 = vmul.f32 %v1339_v20, %v1593_v44  ;;  %v1302_v44 = vld [vmem:[%s1757_s1 + $0xa0] sm:$0xff]  }
 0x113   :  { %v1343_v22 = vpop.eup %1342  ;;  %v1598_v25 = vmul.f32 %v1341_v21, %v139_v46  ;;  %1202 = vmatprep.subr.bf16.mxu0 %v1302_v44  ;;  %v1304_v46 = vld [vmem:[%s1757_s1 + $0xb0] sm:$0xff]  }
 0x114   :  { %v1345_v23 = vpop.eup %1344  ;;  %v1596_v24 = vmul.f32 %v1343_v22, %v1165_v48  ;;  %1203 = vmatpush3.bf16.msra.mxu0 %v1302_v44 }
 0x115   :  { %v1600_v26 = vmul.f32 %v1345_v23, %v142_v51  ;;  %1204 = vmatprep.subr.bf16.mxu0 %v1303_v45 }
 0x116   :  { %v219_v29 = vpack.c.bf16 %v1596_v24, %v1603_v27 }
 0x117   :  { %v218_v28 = vpack.c.bf16 %v1600_v26, %v1598_v25 }
 0x118   :  { %1205 = vmatpush3.bf16.msra.mxu0 %v1303_v45 }
 0x119   :  { %v1347_v30 = vpop.eup %1346  ;;  %1186 = vmatprep.mubr.bf16.mxu1 %v218_v28  ;;  %1206 = vmatprep.subr.bf16.mxu0 %v1304_v46 }
 0x11a   :  { %v1349_v31 = vpop.eup %1348  ;;  %1187 = vmatmul.mubr.bf16.vlgmr.msra.gmra.mrb[0].mxu1 %v219_v29  ;;  %v1615_v37 = vmul.f32 %v1347_v30, %v1168_v56 }
 0x11b   :  { %v1351_v32 = vpop.eup %1350  ;;  %v1611_v35 = vmul.f32 %v1349_v31, %v155_v58 }
 0x11c   :  { %v1353_v33 = vpop.eup %1352  ;;  %v1609_v34 = vmul.f32 %v1351_v32, %v1169_v60  ;;  %1207 = vmatpush3.bf16.msra.mxu0 %v1304_v46 }
 0x11d   :  { %v1613_v36 = vmul.f32 %v1353_v33, %v158_v63  ;;  %1208 = vmatprep.subr.bf16.mxu0 %v1305_v47 }
 0x11e   :  { %v221_v39 = vpack.c.bf16 %v1609_v34, %v1615_v37 }
 0x11f   :  { %v220_v38 = vpack.c.bf16 %v1613_v36, %v1611_v35 }
 0x120   :  { %1209 = vmatpush3.bf16.msra.mxu0 %v1305_v47 }
 0x121   :  { %1190 = vmatprep.mubr.bf16.mxu1 %v220_v38 }
 0x122   :  { %1191 = vmatmul.mubr.bf16.gmra.mrb[4].mxu1 %v221_v39 }
 0x1ed   :  { %v1188_v48 = vpop.f32.mrb[0].mxu1 }
 0x1ee   :  { %v354_v49 = vsub.f32 0.0, %v1188_v48  ;;  %v321_v50 = vpop.f32.mrb[1].mxu1 }
 0x1ef   :  { %v352_v51 = vsub.f32 0.0, %v321_v50  ;;  %v1189_v52 = vpop.f32.mrb[2].mxu1 }
 0x1f0   :  { %v364_v53 = vmul.f32 1.442695, %v354_v49  ;;  %v355_v54 = vsub.f32 0.0, %v1189_v52  ;;  %v324_v55 = vpop.f32.mrb[3].mxu1 }
 0x1f1   :  { %v360_v56 = vmul.f32 1.442695, %v352_v51  ;;  %v353_v57 = vsub.f32 0.0, %v324_v55 }
 0x1f2   :  { %1354 = vpow2.f32 %v364_v53  ;;  %v366_v58 = vmul.f32 1.442695, %v355_v54 }
 0x1f3   :  { %1356 = vpow2.f32 %v360_v56  ;;  %v362_v59 = vmul.f32 1.442695, %v353_v57  ;;  %v1310_v56 = vld [vmem:[%s1757_s1 + $0xe0] sm:$0xff]   ;;  %v1311_v57 = vld [vmem:[%s1757_s1 + $0xe8] sm:$0xff]  }
 0x1f4   :  { %1358 = vpow2.f32 %v366_v58  ;;  %v1312_v58 = vld [vmem:[%s1757_s1 + $0xf0] sm:$0xff]  }
 0x1f5   :  { %1360 = vpow2.f32 %v362_v59  ;;  %v1192_v60 = vpop.f32.mrb[4].mxu1  ;;  %v1313_v59 = vld [vmem:[%s1757_s1 + $0xf8] sm:$0xff]  }
 0x1f6   :  { %v358_v61 = vsub.f32 0.0, %v1192_v60  ;;  %v337_v62 = vpop.f32.mrb[5].mxu1 }
 0x1f7   :  { %v356_v63 = vsub.f32 0.0, %v337_v62  ;;  %v1193_v0 = vpop.f32.mrb[6].mxu1 }
 0x1f8   :  { %v372_v1 = vmul.f32 1.442695, %v358_v61  ;;  %v359_v2 = vsub.f32 0.0, %v1193_v0  ;;  %v340_v3 = vpop.f32.mrb[7].mxu1 }
 0x1f9   :  { %v368_v4 = vmul.f32 1.442695, %v356_v63  ;;  %v357_v5 = vsub.f32 0.0, %v340_v3 }
 0x1fa   :  { %1362 = vpow2.f32 %v372_v1  ;;  %v374_v6 = vmul.f32 1.442695, %v359_v2 }
 0x1fb   :  { %1364 = vpow2.f32 %v368_v4  ;;  %v370_v7 = vmul.f32 1.442695, %v357_v5 }
 0x1fc   :  { %v1355_v8 = vpop.eup %1354  ;;  %1366 = vpow2.f32 %v374_v6 }
 0x1fd   :  { %v1357_v9 = vpop.eup %1356  ;;  %v378_v10 = vadd.f32 1.0, %v1355_v8  ;;  %1368 = vpow2.f32 %v370_v7 }
 0x1fe   :  { %v1359_v11 = vpop.eup %1358  ;;  %v376_v12 = vadd.f32 1.0, %v1357_v9 }
 0x1ff   :  { %v1361_v13 = vpop.eup %1360  ;;  %1370 = vrcp.f32 %v378_v10  ;;  %v379_v14 = vadd.f32 1.0, %v1359_v11 }
 0x200   :  { %1372 = vrcp.f32 %v376_v12  ;;  %v377_v15 = vadd.f32 1.0, %v1361_v13 }
 0x201   :  { %1374 = vrcp.f32 %v379_v14 }
 0x202   :  { %1376 = vrcp.f32 %v377_v15 }
 0x204   :  { %v1363_v16 = vpop.eup %1362 }
 0x205   :  { %v1365_v17 = vpop.eup %1364  ;;  %v382_v18 = vadd.f32 1.0, %v1363_v16 }
 0x206   :  { %v1367_v19 = vpop.eup %1366  ;;  %v380_v20 = vadd.f32 1.0, %v1365_v17 }
 0x207   :  { %v1369_v21 = vpop.eup %1368  ;;  %1378 = vrcp.f32 %v382_v18  ;;  %v383_v22 = vadd.f32 1.0, %v1367_v19 }
 0x208   :  { %1380 = vrcp.f32 %v380_v20  ;;  %v381_v23 = vadd.f32 1.0, %v1369_v21 }
 0x209   :  { %v1371_v28 = vpop.eup %1370  ;;  %1382 = vrcp.f32 %v383_v22 }
 0x20a   :  { %v1373_v29 = vpop.eup %1372  ;;  %1384 = vrcp.f32 %v381_v23  ;;  %v394_v32 = vmul.f32 %v1371_v28, %v1188_v48  ;;  %v1306_v48 = vld [vmem:[%s1757_s1 + $0xc0] sm:$0xff]  }
 0x20b   :  { %v1375_v30 = vpop.eup %1374  ;;  %v392_v38 = vmul.f32 %v1373_v29, %v321_v50  ;;  %1218 = vmatprep.subr.bf16.mxu1 %v1306_v48  ;;  %v1307_v50 = vld [vmem:[%s1757_s1 + $0xc8] sm:$0xff]  }
 0x20c   :  { %v1377_v31 = vpop.eup %1376  ;;  %v395_v33 = vmul.f32 %v1375_v30, %v1189_v52  ;;  %1219 = vmatpush3.bf16.msra.mxu1 %v1306_v48  ;;  %v1308_v52 = vld [vmem:[%s1757_s1 + $0xd0] sm:$0xff]  }
 0x20d   :  { %v393_v39 = vmul.f32 %v1377_v31, %v324_v55  ;;  %1220 = vmatprep.subr.bf16.mxu1 %v1307_v50  ;;  %v1309_v55 = vld [vmem:[%s1757_s1 + $0xd8] sm:$0xff]  }
 0x20e   :  { %v401_v40 = vpack.c.bf16 %v395_v33, %v394_v32 }
 0x20f   :  { %v400_v41 = vpack.c.bf16 %v393_v39, %v392_v38 }
 0x210   :  { %1221 = vmatpush3.bf16.msra.mxu1 %v1307_v50 }
 0x211   :  { %v1379_v42 = vpop.eup %1378  ;;  %1210 = vmatprep.mubr.bf16.mxu0 %v400_v41  ;;  %1222 = vmatprep.subr.bf16.mxu1 %v1308_v52 }
 0x212   :  { %v1381_v43 = vpop.eup %1380  ;;  %1211 = vmatmul.mubr.bf16.vlgmr.msra.gmra.mrb[8].mxu0 %v401_v40  ;;  %v398_v46 = vmul.f32 %v1379_v42, %v1192_v60 }
 0x213   :  { %v1383_v44 = vpop.eup %1382  ;;  %v396_v49 = vmul.f32 %v1381_v43, %v337_v62 }
 0x214   :  { %v1385_v45 = vpop.eup %1384  ;;  %v399_v47 = vmul.f32 %v1383_v44, %v1193_v0  ;;  %1223 = vmatpush3.bf16.msra.mxu1 %v1308_v52 }
 0x215   :  { %v397_v51 = vmul.f32 %v1385_v45, %v340_v3  ;;  %1224 = vmatprep.subr.bf16.mxu1 %v1309_v55 }
 0x216   :  { %v403_v53 = vpack.c.bf16 %v399_v47, %v398_v46 }
 0x217   :  { %v402_v54 = vpack.c.bf16 %v397_v51, %v396_v49 }
 0x218   :  { %1225 = vmatpush3.bf16.msra.mxu1 %v1309_v55 }
 0x219   :  { %1214 = vmatprep.mubr.bf16.mxu0 %v402_v54  ;;  %1226 = vmatprep.subr.bf16.mxu1 %v1310_v56 }
 0x21a   :  { %1215 = vmatmul.mubr.bf16.gmra.mrb[12].mxu0 %v403_v53 }
 0x21c   :  { %1227 = vmatpush3.bf16.msra.mxu1 %v1310_v56 }
 0x21d   :  { %1228 = vmatprep.subr.bf16.mxu1 %v1311_v57 }
 0x220   :  { %1229 = vmatpush3.bf16.msra.mxu1 %v1311_v57 }
 0x221   :  { %1230 = vmatprep.subr.bf16.mxu1 %v1312_v58 }
 0x224   :  { %1231 = vmatpush3.bf16.msra.mxu1 %v1312_v58 }
 0x225   :  { %1232 = vmatprep.subr.bf16.mxu1 %v1313_v59 }
 0x228   :  { %1233 = vmatpush3.bf16.msra.mxu1 %v1313_v59 }
 0x2e5   :  { %v1212_v60 = vpop.f32.mrb[8].mxu0 }
 0x2e6   :  { %v536_v61 = vsub.f32 0.0, %v1212_v60  ;;  %v503_v62 = vpop.f32.mrb[9].mxu0 }
 0x2e7   :  { %v534_v63 = vsub.f32 0.0, %v503_v62  ;;  %v1213_v0 = vpop.f32.mrb[10].mxu0 }
 0x2e8   :  { %v546_v1 = vmul.f32 1.442695, %v536_v61  ;;  %v537_v2 = vsub.f32 0.0, %v1213_v0  ;;  %v506_v3 = vpop.f32.mrb[11].mxu0 }
 0x2e9   :  { %v542_v4 = vmul.f32 1.442695, %v534_v63  ;;  %v535_v5 = vsub.f32 0.0, %v506_v3 }
 0x2ea   :  { %1386 = vpow2.f32 %v546_v1  ;;  %v548_v6 = vmul.f32 1.442695, %v537_v2 }
 0x2eb   :  { %1388 = vpow2.f32 %v542_v4  ;;  %v544_v7 = vmul.f32 1.442695, %v535_v5  ;;  %v1318_v4 = vld [vmem:[%s1757_s1 + $0x120] sm:$0xff]   ;;  %v1319_v5 = vld [vmem:[%s1757_s1 + $0x128] sm:$0xff]  }
 0x2ec   :  { %1390 = vpow2.f32 %v548_v6  ;;  %v1320_v6 = vld [vmem:[%s1757_s1 + $0x130] sm:$0xff]  }
 0x2ed   :  { %1392 = vpow2.f32 %v544_v7  ;;  %v1216_v8 = vpop.f32.mrb[12].mxu0  ;;  %v1321_v7 = vld [vmem:[%s1757_s1 + $0x138] sm:$0xff]  }
 0x2ee   :  { %v540_v9 = vsub.f32 0.0, %v1216_v8  ;;  %v519_v10 = vpop.f32.mrb[13].mxu0 }
 0x2ef   :  { %v538_v11 = vsub.f32 0.0, %v519_v10  ;;  %v1217_v12 = vpop.f32.mrb[14].mxu0 }
 0x2f0   :  { %v554_v13 = vmul.f32 1.442695, %v540_v9  ;;  %v541_v14 = vsub.f32 0.0, %v1217_v12  ;;  %v522_v15 = vpop.f32.mrb[15].mxu0 }
 0x2f1   :  { %v550_v16 = vmul.f32 1.442695, %v538_v11  ;;  %v539_v17 = vsub.f32 0.0, %v522_v15 }
 0x2f2   :  { %1394 = vpow2.f32 %v554_v13  ;;  %v556_v18 = vmul.f32 1.442695, %v541_v14 }
 0x2f3   :  { %1396 = vpow2.f32 %v550_v16  ;;  %v552_v19 = vmul.f32 1.442695, %v539_v17 }
 0x2f4   :  { %v1387_v20 = vpop.eup %1386  ;;  %1398 = vpow2.f32 %v556_v18 }
 0x2f5   :  { %v1389_v21 = vpop.eup %1388  ;;  %v560_v22 = vadd.f32 1.0, %v1387_v20  ;;  %1400 = vpow2.f32 %v552_v19 }
 0x2f6   :  { %v1391_v23 = vpop.eup %1390  ;;  %v558_v28 = vadd.f32 1.0, %v1389_v21 }
 0x2f7   :  { %v1393_v29 = vpop.eup %1392  ;;  %1402 = vrcp.f32 %v560_v22  ;;  %v561_v30 = vadd.f32 1.0, %v1391_v23 }
 0x2f8   :  { %1404 = vrcp.f32 %v558_v28  ;;  %v559_v31 = vadd.f32 1.0, %v1393_v29 }
 0x2f9   :  { %1406 = vrcp.f32 %v561_v30 }
 0x2fa   :  { %1408 = vrcp.f32 %v559_v31 }
 0x2fc   :  { %v1395_v32 = vpop.eup %1394 }
 0x2fd   :  { %v1397_v33 = vpop.eup %1396  ;;  %v564_v38 = vadd.f32 1.0, %v1395_v32 }
 0x2fe   :  { %v1399_v39 = vpop.eup %1398  ;;  %v562_v40 = vadd.f32 1.0, %v1397_v33 }
 0x2ff   :  { %v1401_v41 = vpop.eup %1400  ;;  %1410 = vrcp.f32 %v564_v38  ;;  %v565_v42 = vadd.f32 1.0, %v1399_v39 }
 0x300   :  { %1412 = vrcp.f32 %v562_v40  ;;  %v563_v43 = vadd.f32 1.0, %v1401_v41 }
 0x301   :  { %v1403_v44 = vpop.eup %1402  ;;  %1414 = vrcp.f32 %v565_v42 }
 0x302   :  { %v1405_v45 = vpop.eup %1404  ;;  %1416 = vrcp.f32 %v563_v43  ;;  %v576_v51 = vmul.f32 %v1403_v44, %v1212_v60 }
 0x303   :  { %v1407_v46 = vpop.eup %1406  ;;  %v574_v47 = vmul.f32 %v1405_v45, %v503_v62 }
 0x304   :  { %v1409_v49 = vpop.eup %1408  ;;  %v577_v53 = vmul.f32 %v1407_v46, %v1213_v0  ;;  %v1679_v55 = vadd.f32 %v576_v51, %v1603_v27 }
 0x305   :  { %v575_v54 = vmul.f32 %v1409_v49, %v506_v3  ;;  %v1673_v50 = vadd.f32 %v574_v47, %v1598_v25 }
 0x306   :  { %v1670_v48 = vadd.f32 %v577_v53, %v1596_v24 }
 0x307   :  { %v1676_v52 = vadd.f32 %v575_v54, %v1600_v26 }
 0x308   :  { %v591_v59 = vpack.c.bf16 %v1670_v48, %v1679_v55 }
 0x309   :  { %v1411_v56 = vpop.eup %1410  ;;  %v590_v57 = vpack.c.bf16 %v1676_v52, %v1673_v50 }
 0x30a   :  { %v1413_v58 = vpop.eup %1412  ;;  %v580_v25 = vmul.f32 %v1411_v56, %v1216_v8 }
 0x30b   :  { %v1415_v60 = vpop.eup %1414  ;;  %v578_v24 = vmul.f32 %v1413_v58, %v519_v10  ;;  %1234 = vmatprep.mubr.bf16.mxu1 %v590_v57 }
 0x30c   :  { %v1417_v61 = vpop.eup %1416  ;;  %v581_v62 = vmul.f32 %v1415_v60, %v1217_v12  ;;  %1235 = vmatmul.mubr.bf16.vlgmr.msra.gmra.mrb[8].mxu1 %v591_v59  ;;  %v1695_v1 = vadd.f32 %v580_v25, %v1615_v37  ;;  %v1317_v37 = vld [vmem:[%s1757_s1 + $0x118] sm:$0xff]  }
 0x30d   :  { %v579_v26 = vmul.f32 %v1417_v61, %v522_v15  ;;  %v1689_v27 = vadd.f32 %v578_v24, %v1611_v35  ;;  %v1315_v35 = vld [vmem:[%s1757_s1 + $0x108] sm:$0xff]  }
 0x30e   :  { %v1686_v63 = vadd.f32 %v581_v62, %v1609_v34  ;;  %v1314_v34 = vld [vmem:[%s1757_s1 + $0x100] sm:$0xff]  }
 0x30f   :  { %v1692_v0 = vadd.f32 %v579_v26, %v1613_v36  ;;  %1242 = vmatprep.subr.bf16.mxu0 %v1314_v34  ;;  %1266 = vmatprep.subr.bf16.mxu1 %v1314_v34  ;;  %v1316_v36 = vld [vmem:[%s1757_s1 + $0x110] sm:$0xff]  }
 0x310   :  { %v593_v3 = vpack.c.bf16 %v1686_v63, %v1695_v1  ;;  %1243 = vmatpush3.bf16.msra.mxu0 %v1314_v34  ;;  %1274 = vmatpush3.bf16.msra.mxu1 %v1314_v34 }
 0x311   :  { %v592_v2 = vpack.c.bf16 %v1692_v0, %v1689_v27  ;;  %1244 = vmatprep.subr.bf16.mxu0 %v1315_v35  ;;  %1267 = vmatprep.subr.bf16.mxu1 %v1315_v35 }
 0x313   :  { %1238 = vmatprep.mubr.bf16.mxu1 %v592_v2 }
 0x314   :  { %1239 = vmatmul.mubr.bf16.gmra.mrb[12].mxu1 %v593_v3  ;;  %1245 = vmatpush3.bf16.msra.mxu0 %v1315_v35 }
 0x315   :  { %1275 = vmatpush3.bf16.msra.mxu1 %v1315_v35  ;;  %1246 = vmatprep.subr.bf16.mxu0 %v1316_v36 }
 0x316   :  { %1268 = vmatprep.subr.bf16.mxu1 %v1316_v36 }
 0x318   :  { %1247 = vmatpush3.bf16.msra.mxu0 %v1316_v36 }
 0x319   :  { %1276 = vmatpush3.bf16.msra.mxu1 %v1316_v36  ;;  %1248 = vmatprep.subr.bf16.mxu0 %v1317_v37 }
 0x31a   :  { %1269 = vmatprep.subr.bf16.mxu1 %v1317_v37 }
 0x31c   :  { %1249 = vmatpush3.bf16.msra.mxu0 %v1317_v37 }
 0x31d   :  { %1277 = vmatpush3.bf16.msra.mxu1 %v1317_v37  ;;  %1250 = vmatprep.subr.bf16.mxu0 %v1318_v4 }
 0x31e   :  { %1270 = vmatprep.subr.bf16.mxu1 %v1318_v4 }
 0x320   :  { %1251 = vmatpush3.bf16.msra.mxu0 %v1318_v4 }
 0x321   :  { %1278 = vmatpush3.bf16.msra.mxu1 %v1318_v4  ;;  %1252 = vmatprep.subr.bf16.mxu0 %v1319_v5 }
 0x322   :  { %1271 = vmatprep.subr.bf16.mxu1 %v1319_v5 }
 0x324   :  { %1253 = vmatpush3.bf16.msra.mxu0 %v1319_v5 }
 0x325   :  { %1279 = vmatpush3.bf16.msra.mxu1 %v1319_v5  ;;  %1254 = vmatprep.subr.bf16.mxu0 %v1320_v6 }
 0x326   :  { %1272 = vmatprep.subr.bf16.mxu1 %v1320_v6 }
 0x328   :  { %1255 = vmatpush3.bf16.msra.mxu0 %v1320_v6 }
 0x329   :  { %1280 = vmatpush3.bf16.msra.mxu1 %v1320_v6  ;;  %1256 = vmatprep.subr.bf16.mxu0 %v1321_v7 }
 0x32a   :  { %1273 = vmatprep.subr.bf16.mxu1 %v1321_v7 }
 0x32c   :  { %1257 = vmatpush3.bf16.msra.mxu0 %v1321_v7 }
 0x32d   :  { %1281 = vmatpush3.bf16.msra.mxu1 %v1321_v7 }
 0x3df   :  { %v1236_v8 = vpop.f32.mrb[8].mxu1 }
 0x3e0   :  { %v726_v9 = vsub.f32 0.0, %v1236_v8  ;;  %v693_v10 = vpop.f32.mrb[9].mxu1 }
 0x3e1   :  { %v724_v11 = vsub.f32 0.0, %v693_v10  ;;  %v1237_v12 = vpop.f32.mrb[10].mxu1 }
 0x3e2   :  { %v736_v13 = vmul.f32 1.442695, %v726_v9  ;;  %v727_v14 = vsub.f32 0.0, %v1237_v12  ;;  %v696_v15 = vpop.f32.mrb[11].mxu1 }
 0x3e3   :  { %v732_v16 = vmul.f32 1.442695, %v724_v11  ;;  %v725_v17 = vsub.f32 0.0, %v696_v15 }
 0x3e4   :  { %1418 = vpow2.f32 %v736_v13  ;;  %v738_v18 = vmul.f32 1.442695, %v727_v14 }
 0x3e5   :  { %1420 = vpow2.f32 %v732_v16  ;;  %v734_v19 = vmul.f32 1.442695, %v725_v17 }
 0x3e6   :  { %1422 = vpow2.f32 %v738_v18 }
 0x3e7   :  { %1424 = vpow2.f32 %v734_v19  ;;  %v1240_v20 = vpop.f32.mrb[12].mxu1 }
 0x3e8   :  { %v730_v21 = vsub.f32 0.0, %v1240_v20  ;;  %v709_v22 = vpop.f32.mrb[13].mxu1 }
 0x3e9   :  { %v728_v23 = vsub.f32 0.0, %v709_v22  ;;  %v1241_v28 = vpop.f32.mrb[14].mxu1 }
 0x3ea   :  { %v744_v29 = vmul.f32 1.442695, %v730_v21  ;;  %v731_v30 = vsub.f32 0.0, %v1241_v28  ;;  %v712_v31 = vpop.f32.mrb[15].mxu1 }
 0x3eb   :  { %v740_v32 = vmul.f32 1.442695, %v728_v23  ;;  %v729_v33 = vsub.f32 0.0, %v712_v31 }
 0x3ec   :  { %1426 = vpow2.f32 %v744_v29  ;;  %v746_v38 = vmul.f32 1.442695, %v731_v30 }
 0x3ed   :  { %1428 = vpow2.f32 %v740_v32  ;;  %v742_v39 = vmul.f32 1.442695, %v729_v33 }
 0x3ee   :  { %v1419_v40 = vpop.eup %1418  ;;  %1430 = vpow2.f32 %v746_v38 }
 0x3ef   :  { %v1421_v41 = vpop.eup %1420  ;;  %v750_v42 = vadd.f32 1.0, %v1419_v40  ;;  %1432 = vpow2.f32 %v742_v39 }
 0x3f0   :  { %v1423_v43 = vpop.eup %1422  ;;  %v748_v44 = vadd.f32 1.0, %v1421_v41 }
 0x3f1   :  { %v1425_v45 = vpop.eup %1424  ;;  %1434 = vrcp.f32 %v750_v42  ;;  %v751_v46 = vadd.f32 1.0, %v1423_v43 }
 0x3f2   :  { %1436 = vrcp.f32 %v748_v44  ;;  %v749_v47 = vadd.f32 1.0, %v1425_v45 }
 0x3f3   :  { %1438 = vrcp.f32 %v751_v46 }
 0x3f4   :  { %1440 = vrcp.f32 %v749_v47 }
 0x3f6   :  { %v1427_v49 = vpop.eup %1426 }
 0x3f7   :  { %v1429_v51 = vpop.eup %1428  ;;  %v754_v53 = vadd.f32 1.0, %v1427_v49 }
 0x3f8   :  { %v1431_v54 = vpop.eup %1430  ;;  %v752_v56 = vadd.f32 1.0, %v1429_v51 }
 0x3f9   :  { %v1433_v57 = vpop.eup %1432  ;;  %1442 = vrcp.f32 %v754_v53  ;;  %v755_v58 = vadd.f32 1.0, %v1431_v54 }
 0x3fa   :  { %1444 = vrcp.f32 %v752_v56  ;;  %v753_v59 = vadd.f32 1.0, %v1433_v57 }
 0x3fb   :  { %v1435_v60 = vpop.eup %1434  ;;  %1446 = vrcp.f32 %v755_v58 }
 0x3fc   :  { %v1437_v24 = vpop.eup %1436  ;;  %1448 = vrcp.f32 %v753_v59  ;;  %v766_v62 = vmul.f32 %v1435_v60, %v1236_v8 }
 0x3fd   :  { %v1439_v61 = vpop.eup %1438  ;;  %v764_v2 = vmul.f32 %v1437_v24, %v693_v10 }
 0x3fe   :  { %v1441_v25 = vpop.eup %1440  ;;  %v767_v26 = vmul.f32 %v1439_v61, %v1237_v12 }
 0x3ff   :  { %v765_v3 = vmul.f32 %v1441_v25, %v696_v15 }
 0x400   :  { %v773_v34 = vpack.c.bf16 %v767_v26, %v766_v62 }
 0x401   :  { %v772_v35 = vpack.c.bf16 %v765_v3, %v764_v2 }
 0x403   :  { %v1443_v36 = vpop.eup %1442  ;;  %1258 = vmatprep.mubr.bf16.mxu0 %v772_v35 }
 0x404   :  { %v1445_v37 = vpop.eup %1444  ;;  %1259 = vmatmul.mubr.bf16.vlgmr.msra.gmra.mrb[16].mxu0 %v773_v34  ;;  %v770_v6 = vmul.f32 %v1443_v36, %v1240_v20 }
 0x405   :  { %v1447_v4 = vpop.eup %1446  ;;  %v768_v9 = vmul.f32 %v1445_v37, %v709_v22 }
 0x406   :  { %v1449_v5 = vpop.eup %1448  ;;  %v771_v7 = vmul.f32 %v1447_v4, %v1241_v28 }
 0x407   :  { %v769_v11 = vmul.f32 %v1449_v5, %v712_v31 }
 0x408   :  { %v775_v13 = vpack.c.bf16 %v771_v7, %v770_v6 }
 0x409   :  { %v774_v14 = vpack.c.bf16 %v769_v11, %v768_v9 }
 0x40b   :  { %1262 = vmatprep.mubr.bf16.mxu1 %v774_v14 }
 0x40c   :  { %1263 = vmatmul.mubr.bf16.vlgmr.msra.gmra.mrb[16].mxu1 %v775_v13 }
 0x4d7   :  { %v1260_v8 = vpop.f32.mrb[16].mxu0 }
 0x4d8   :  { %v908_v12 = vsub.f32 0.0, %v1260_v8  ;;  %v875_v10 = vpop.f32.mrb[17].mxu0 }
 0x4d9   :  { %v906_v15 = vsub.f32 0.0, %v875_v10  ;;  %v1261_v16 = vpop.f32.mrb[18].mxu0 }
 0x4da   :  { %v918_v17 = vmul.f32 1.442695, %v908_v12  ;;  %v909_v18 = vsub.f32 0.0, %v1261_v16  ;;  %v878_v19 = vpop.f32.mrb[19].mxu0 }
 0x4db   :  { %v914_v21 = vmul.f32 1.442695, %v906_v15  ;;  %v907_v23 = vsub.f32 0.0, %v878_v19 }
 0x4dc   :  { %1450 = vpow2.f32 %v918_v17  ;;  %v920_v29 = vmul.f32 1.442695, %v909_v18 }
 0x4dd   :  { %1452 = vpow2.f32 %v914_v21  ;;  %v916_v20 = vmul.f32 1.442695, %v907_v23 }
 0x4de   :  { %1454 = vpow2.f32 %v920_v29 }
 0x4df   :  { %1456 = vpow2.f32 %v916_v20  ;;  %v1264_v22 = vpop.f32.mrb[16].mxu1 }
 0x4e0   :  { %v912_v28 = vsub.f32 0.0, %v1264_v22  ;;  %v891_v30 = vpop.f32.mrb[17].mxu1 }
 0x4e1   :  { %v910_v31 = vsub.f32 0.0, %v891_v30  ;;  %v1265_v32 = vpop.f32.mrb[18].mxu1 }
 0x4e2   :  { %v926_v33 = vmul.f32 1.442695, %v912_v28  ;;  %v913_v38 = vsub.f32 0.0, %v1265_v32  ;;  %v894_v39 = vpop.f32.mrb[19].mxu1 }
 0x4e3   :  { %v922_v40 = vmul.f32 1.442695, %v910_v31  ;;  %v911_v41 = vsub.f32 0.0, %v894_v39 }
 0x4e4   :  { %1458 = vpow2.f32 %v926_v33  ;;  %v928_v42 = vmul.f32 1.442695, %v913_v38 }
 0x4e5   :  { %1460 = vpow2.f32 %v922_v40  ;;  %v924_v43 = vmul.f32 1.442695, %v911_v41 }
 0x4e6   :  { %v1451_v44 = vpop.eup %1450  ;;  %1462 = vpow2.f32 %v928_v42 }
 0x4e7   :  { %v1453_v45 = vpop.eup %1452  ;;  %v932_v46 = vadd.f32 1.0, %v1451_v44  ;;  %1464 = vpow2.f32 %v924_v43 }
 0x4e8   :  { %v1455_v47 = vpop.eup %1454  ;;  %v930_v49 = vadd.f32 1.0, %v1453_v45 }
 0x4e9   :  { %v1457_v51 = vpop.eup %1456  ;;  %1466 = vrcp.f32 %v932_v46  ;;  %v933_v53 = vadd.f32 1.0, %v1455_v47 }
 0x4ea   :  { %1468 = vrcp.f32 %v930_v49  ;;  %v931_v54 = vadd.f32 1.0, %v1457_v51 }
 0x4eb   :  { %1470 = vrcp.f32 %v933_v53 }
 0x4ec   :  { %1472 = vrcp.f32 %v931_v54 }
 0x4ee   :  { %v1459_v56 = vpop.eup %1458 }
 0x4ef   :  { %v1461_v57 = vpop.eup %1460  ;;  %v936_v58 = vadd.f32 1.0, %v1459_v56 }
 0x4f0   :  { %v1463_v59 = vpop.eup %1462  ;;  %v934_v60 = vadd.f32 1.0, %v1461_v57 }
 0x4f1   :  { %v1465_v24 = vpop.eup %1464  ;;  %1474 = vrcp.f32 %v936_v58  ;;  %v937_v61 = vadd.f32 1.0, %v1463_v59 }
 0x4f2   :  { %1476 = vrcp.f32 %v934_v60  ;;  %v935_v25 = vadd.f32 1.0, %v1465_v24 }
 0x4f3   :  { %v1467_v62 = vpop.eup %1466  ;;  %1478 = vrcp.f32 %v937_v61 }
 0x4f4   :  { %v1469_v26 = vpop.eup %1468  ;;  %v948_v2 = vmul.f32 %v1467_v62, %v1260_v8  ;;  %1480 = vrcp.f32 %v935_v25 }
 0x4f5   :  { %v1471_v3 = vpop.eup %1470  ;;  %v946_v34 = vmul.f32 %v1469_v26, %v875_v10 }
 0x4f6   :  { %v1473_v35 = vpop.eup %1472  ;;  %v956_v36 = vadd.f32 %v948_v2, %v1679_v55  ;;  %v949_v37 = vmul.f32 %v1471_v3, %v1261_v16 }
 0x4f7   :  { %v954_v4 = vadd.f32 %v946_v34, %v1673_v50  ;;  %v947_v5 = vmul.f32 %v1473_v35, %v878_v19 }
 0x4f8   :  { %964 = vst [vmem:[%s1759_s2 + $0x10] sm:$0xff] %v956_v36  ;;  %v957_v6 = vadd.f32 %v949_v37, %v1670_v48 }
 0x4f9   :  { %962 = vst [vmem:[%s1759_s2] sm:$0xff] %v954_v4  ;;  %v955_v7 = vadd.f32 %v947_v5, %v1676_v52 }
 0x4fa   :  { %965 = vst [vmem:[%s1759_s2 + $0x18] sm:$0xff] %v957_v6 }
 0x4fb   :  { %v1475_v55 = vpop.eup %1474  ;;  %963 = vst [vmem:[%s1759_s2 + $0x8] sm:$0xff] %v955_v7 }
 0x4fc   :  { %v1477_v50 = vpop.eup %1476  ;;  %v952_v9 = vmul.f32 %v1475_v55, %v1264_v22 }
 0x4fd   :  { %v1479_v11 = vpop.eup %1478  ;;  %v950_v13 = vmul.f32 %v1477_v50, %v891_v30 }
 0x4fe   :  { %v1481_v48 = vpop.eup %1480  ;;  %v960_v14 = vadd.f32 %v952_v9, %v1695_v1  ;;  %v953_v8 = vmul.f32 %v1479_v11, %v1265_v32 }
 0x4ff   :  { %v958_v12 = vadd.f32 %v950_v13, %v1689_v27  ;;  %v951_v52 = vmul.f32 %v1481_v48, %v894_v39 }
 0x500   :  { %968 = vst [vmem:[%s1759_s2 + $0x30] sm:$0xff] %v960_v14  ;;  %v961_v10 = vadd.f32 %v953_v8, %v1686_v63 }
 0x501   :  { %966 = vst [vmem:[%s1759_s2 + $0x20] sm:$0xff] %v958_v12  ;;  %v959_v15 = vadd.f32 %v951_v52, %v1692_v0 }
 0x502   :  { %969 = vst [vmem:[%s1759_s2 + $0x38] sm:$0xff] %v961_v10 }
 0x503   :  { %967 = vst [vmem:[%s1759_s2 + $0x28] sm:$0xff] %v959_v15 }

</bundles_post_ra>
